<compile_context>
chip_gen: v5e
topology: v5e:2x2
jax: 0.10.0
libtpu: 0.0.40
codegen_flags: <defaults>
</compile_context>

<pallas_src>
import functools

import jax
import jax.numpy as jnp
from jax.experimental import pallas as pl
from jax.experimental.pallas import tpu as pltpu


def _round_up(x, m):
    return -(-x // m) * m


# ---------------------------------------------------------------------------
# Fused kernel: conv1(3x3)+bias+ReLU -> conv2(3x3)+bias+ReLU, one batch elem.
# ---------------------------------------------------------------------------
def _block_kernel(p1_ref, w1_ref, b1_ref, w2_ref, b2_ref, o_ref, y_scr,
                  *, Wg, M2):
    # p1_ref: (1, My, K1p) bf16 -- conv1 im2col patch (lane-dense, K zero-padded)
    # w1_ref: (K1p, C)     bf16 -- flattened conv1 weights (zero rows for K pad)
    # b1_ref: (1, C)       f32
    # w2_ref: (9, C, C)    bf16 -- conv2 weights per tap t = kh*3 + kw
    # b2_ref: (1, C)       f32
    # o_ref:  (1, M2, C)        -- conv2 output on the flattened (h*Wg+w) grid
    # y_scr:  (My, C)      bf16 -- conv1 activation, VMEM-resident (never in HBM)

    # ---- conv1 + bias + ReLU: a single lane-dense MXU matmul over the
    # wrapper-built im2col patch (K1p = 128 zero-padded -> numerically exact).
    y = jnp.dot(p1_ref[0], w1_ref[...], preferred_element_type=jnp.float32)
    y = jnp.maximum(y + b1_ref[...], 0.0)
    y_scr[...] = y.astype(jnp.bfloat16)

    # ---- conv2 + bias + ReLU: per-tap accumulation straight out of the VMEM
    # scratch.  Tap (kh, kw) of output position (h, w) is y at flattened index
    # (h+kh)*Wg + (w+kw) = (kh*Wg + kw) + (h*Wg + w), i.e. a contiguous
    # sublane slice of y_scr shifted by kh*Wg + kw.  Entries that wrap across
    # a row land only in padded output columns, which the wrapper discards.
    C = o_ref.shape[-1]
    acc = jnp.zeros((M2, C), jnp.float32) + b2_ref[...]
    for kh in range(3):
        for kw in range(3):
            t = kh * 3 + kw
            tap = y_scr[pl.ds(kh * Wg + kw, M2), :]           # (M2, C) bf16
            acc = acc + jnp.dot(tap, w2_ref[t],
                                preferred_element_type=jnp.float32)
    o_ref[0] = jnp.maximum(acc, 0.0).astype(o_ref.dtype)


# ---------------------------------------------------------------------------
# Wrapper: NCHW in / NCHW out, weights in HWIO layout.
# ---------------------------------------------------------------------------
def block_forward(x_nchw, w1, b1, w2, b2, *, out_dtype=jnp.bfloat16):
    """relu(conv2(relu(conv1(x)))), both convs 3x3 valid, stride 1.

    x_nchw: (N, in_c, H, W); w1: (3,3,in_c,C) HWIO; b1: (C,);
    w2: (3,3,C,C) HWIO; b2: (C,).  Returns (N, C, H-4, W-4).
    """
    N, in_c, H, W = x_nchw.shape
    C = w1.shape[-1]
    Ho1, Wo1 = H - 2, W - 2            # conv1 output extent
    Ho2, Wo2 = H - 4, W - 4            # conv2 output extent
    assert Ho2 >= 1 and Wo2 >= 1

    # Common flattened spatial grid: width padded to a multiple of 8 so every
    # in-kernel tap access is a clean sublane slice; one extra conv1 row so
    # the shifted conv2 tap slices stay inside the scratch.
    Wg = _round_up(Wo1, 8)
    Hy = Ho1 + 1
    My = Hy * Wg                        # conv1 rows (flattened, incl. padding)
    M2 = Ho2 * Wg                       # conv2 rows (flattened, incl. padding)
    K1 = 9 * in_c
    K1p = _round_up(K1, 128)            # lane-dense patch / unmasked MXU feed

    # --- one-time XLA-side staging (cheap: the raw input is tiny) -----------
    x = jnp.transpose(x_nchw, (0, 2, 3, 1))                     # NCHW -> NHWC
    xp = jnp.pad(x, ((0, 0), (0, Hy + 2 - H), (0, Wg + 2 - W), (0, 0)))
    taps = [xp[:, kh:kh + Hy, kw:kw + Wg, :]
            for kh in range(3) for kw in range(3)]
    p1 = jnp.concatenate(taps, axis=-1).reshape(N, My, K1)
    p1 = jnp.pad(p1, ((0, 0), (0, 0), (0, K1p - K1))).astype(jnp.bfloat16)

    w1f = jnp.pad(w1.reshape(K1, C), ((0, K1p - K1), (0, 0))).astype(jnp.bfloat16)
    b1f = b1.reshape(1, C).astype(jnp.float32)
    w2f = w2.reshape(9, C, C).astype(jnp.bfloat16)
    b2f = b2.reshape(1, C).astype(jnp.float32)

    kernel = functools.partial(_block_kernel, Wg=Wg, M2=M2)

    out = pl.pallas_call(
        kernel,
        out_shape=jax.ShapeDtypeStruct((N, M2, C), out_dtype),
        grid_spec=pltpu.PrefetchScalarGridSpec(
            num_scalar_prefetch=0,
            grid=(N,),
            in_specs=[
                pl.BlockSpec((1, My, K1p), lambda n: (n, 0, 0)),
                pl.BlockSpec((K1p, C), lambda n: (0, 0)),
                pl.BlockSpec((1, C), lambda n: (0, 0)),
                pl.BlockSpec((9, C, C), lambda n: (0, 0, 0)),
                pl.BlockSpec((1, C), lambda n: (0, 0)),
            ],
            out_specs=pl.BlockSpec((1, M2, C), lambda n: (n, 0, 0)),
            scratch_shapes=[pltpu.VMEM((My, C), jnp.bfloat16)],
        ),
        compiler_params=pltpu.CompilerParams(
            dimension_semantics=("parallel",)),
    )(p1, w1f, b1f, w2f, b2f)

    # Drop padded columns, back to NCHW.  The padded rows/columns of the
    # internal grids hold finite garbage (convs over zero-padded input); it is
    # all excluded here and never feeds a valid output position.
    z = out.reshape(N, Ho2, Wg, C)[:, :, :Wo2, :]
    return jnp.transpose(z, (0, 3, 1, 2))


# ---------------------------------------------------------------------------
# Pure-JAX references
# ---------------------------------------------------------------------------
def block_reference(x_nchw, w1, b1, w2, b2, *, mixed=True):
    """lax.conv reference.  mixed=True mirrors the kernel's bf16-input /
    f32-accumulate policy (tight comparison); mixed=False is pure f32."""
    cdt = jnp.bfloat16 if mixed else jnp.float32
    x = jnp.transpose(x_nchw, (0, 2, 3, 1))

    def conv_relu(t, w, b):
        y = jax.lax.conv_general_dilated(
            t.astype(cdt), w.astype(cdt), (1, 1), "VALID",
            dimension_numbers=("NHWC", "HWIO", "NHWC"),
            preferred_element_type=jnp.float32)
        return jnp.maximum(y + b.astype(jnp.float32), 0.0)

    y = conv_relu(x, w1, b1)
    if mixed:
        y = y.astype(jnp.bfloat16)
    z = conv_relu(y, w2, b2)
    return jnp.transpose(z, (0, 3, 1, 2))


if __name__ == "__main__":
    # Block(in_c=4, out_c=32) on a 2x4x16x16 NCHW input (PyTorch-style).
    in_c, out_c = 4, 32
    N, H, W = 2, 16, 16
    key = jax.random.PRNGKey(0)
    kx, k1, k2, k3, k4 = jax.random.split(key, 5)
    x = jax.random.normal(kx, (N, in_c, H, W), jnp.float32)
    s1 = 1.0 / (in_c * 9) ** 0.5
    w1 = jax.random.uniform(k1, (3, 3, in_c, out_c), jnp.float32, -s1, s1)
    b1 = jax.random.uniform(k2, (out_c,), jnp.float32, -s1, s1)
    s2 = 1.0 / (out_c * 9) ** 0.5
    w2 = jax.random.uniform(k3, (3, 3, out_c, out_c), jnp.float32, -s2, s2)
    b2 = jax.random.uniform(k4, (out_c,), jnp.float32, -s2, s2)

    fwd = jax.jit(block_forward)
    out = jax.block_until_ready(fwd(x, w1, b1, w2, b2))
    assert out.shape == (N, out_c, H - 4, W - 4), out.shape

    # Tight check vs. a reference with the same bf16-in / f32-accumulate policy
    # (difference is final bf16 rounding + accumulation order only).
    ref = block_reference(x, w1, b1, w2, b2, mixed=True)
    err = float(jnp.max(jnp.abs(out.astype(jnp.float32) - ref)))
    assert err < 2e-2, f"max abs err vs bf16-policy reference: {err}"

    # Looser sanity check vs. the pure-f32 reference (bf16 rounding of
    # activations / weights / output).
    ref32 = block_reference(x, w1, b1, w2, b2, mixed=False)
    err32 = float(jnp.max(jnp.abs(out.astype(jnp.float32) - ref32)))
    assert err32 < 1e-1, f"max abs err vs f32 reference: {err32}"

    print("KERNEL_OK")
</pallas_src>

<mosaic_0001>
module attributes {stable_mosaic.version = 11 : i64} {
  func.func @_block_kernel(%arg0: i32, %arg1: memref<1x240x128xbf16, #tpu.memory_space<vmem>>, %arg2: memref<128x32xbf16, #tpu.memory_space<vmem>>, %arg3: memref<1x32xf32, #tpu.memory_space<vmem>>, %arg4: memref<9x32x32xbf16, #tpu.memory_space<vmem>>, %arg5: memref<1x32xf32, #tpu.memory_space<vmem>>, %arg6: memref<1x192x32xbf16, #tpu.memory_space<vmem>>, %arg7: memref<240x32xbf16, #tpu.memory_space<vmem>>) attributes {dimension_semantics = [#tpu.dimension_semantics<parallel>], iteration_bounds = array<i64: 2>, scalar_prefetch = 0 : i64, scratch_operands = 1 : i64, tpu.core_type = #tpu.core_type<tc>, window_params = [{transform_indices = @transform_0, window_bounds = array<i64: 1, 240, 128>}, {pipeline_mode = #tpu.pipeline_mode<synchronous>, transform_indices = @transform_1, window_bounds = array<i64: 128, 32>}, {pipeline_mode = #tpu.pipeline_mode<synchronous>, transform_indices = @transform_2, window_bounds = array<i64: 1, 32>}, {pipeline_mode = #tpu.pipeline_mode<synchronous>, transform_indices = @transform_3, window_bounds = array<i64: 9, 32, 32>}, {pipeline_mode = #tpu.pipeline_mode<synchronous>, transform_indices = @transform_4, window_bounds = array<i64: 1, 32>}, {transform_indices = @transform_5, window_bounds = array<i64: 1, 192, 32>}]} {
    %c0 = arith.constant 0 : index
    %c0_0 = arith.constant 0 : index
    %c0_1 = arith.constant 0 : index
    %0 = vector.load %arg1[%c0, %c0_0, %c0_1] : memref<1x240x128xbf16, #tpu.memory_space<vmem>>, vector<1x240x128xbf16>
    %1 = vector.shape_cast %0 : vector<1x240x128xbf16> to vector<240x128xbf16>
    %c0_2 = arith.constant 0 : index
    %c0_3 = arith.constant 0 : index
    %2 = vector.load %arg2[%c0_2, %c0_3] : memref<128x32xbf16, #tpu.memory_space<vmem>>, vector<128x32xbf16>
    %cst = arith.constant dense<0.000000e+00> : vector<240x32xf32>
    %3 = tpu.matmul %1, %2, %cst {dimension_numbers = #tpu.dot_dimension_numbers<[1], [0], [0], [1], [0, 0, 1, 1], [], []>} : vector<240x128xbf16>, vector<128x32xbf16>, vector<240x32xf32> -> vector<240x32xf32>
    %c0_4 = arith.constant 0 : index
    %c0_5 = arith.constant 0 : index
    %4 = vector.load %arg3[%c0_4, %c0_5] : memref<1x32xf32, #tpu.memory_space<vmem>>, vector<1x32xf32>
    %5 = vector.broadcast %4 : vector<1x32xf32> to vector<240x32xf32>
    %6 = arith.addf %3, %5 : vector<240x32xf32>
    %cst_6 = arith.constant 0.000000e+00 : f32
    %7 = vector.broadcast %cst_6 : f32 to vector<240x32xf32>
    %8 = arith.maximumf %6, %7 : vector<240x32xf32>
    %9 = arith.truncf %8 : vector<240x32xf32> to vector<240x32xbf16>
    %c0_7 = arith.constant 0 : index
    %c0_8 = arith.constant 0 : index
    %10 = vector.load %arg7[%c0_7, %c0_8] : memref<240x32xbf16, #tpu.memory_space<vmem>>, vector<240x32xbf16>
    tpu.vector_store %arg7[%c0_7, %c0_8], %9 {strides = array<i32>} : memref<240x32xbf16, #tpu.memory_space<vmem>>, vector<240x32xbf16>,
    %cst_9 = arith.constant 0.000000e+00 : f32
    %11 = vector.broadcast %cst_9 : f32 to vector<192x32xf32>
    %c0_10 = arith.constant 0 : index
    %c0_11 = arith.constant 0 : index
    %12 = vector.load %arg5[%c0_10, %c0_11] : memref<1x32xf32, #tpu.memory_space<vmem>>, vector<1x32xf32>
    %13 = vector.broadcast %12 : vector<1x32xf32> to vector<192x32xf32>
    %14 = arith.addf %11, %13 : vector<192x32xf32>
    %c0_12 = arith.constant 0 : index
    %c0_13 = arith.constant 0 : index
    %15 = vector.load %arg7[%c0_12, %c0_13] : memref<240x32xbf16, #tpu.memory_space<vmem>>, vector<192x32xbf16>
    %c0_14 = arith.constant 0 : index
    %c0_15 = arith.constant 0 : index
    %c0_16 = arith.constant 0 : index
    %16 = vector.load %arg4[%c0_14, %c0_15, %c0_16] : memref<9x32x32xbf16, #tpu.memory_space<vmem>>, vector<1x32x32xbf16>
    %17 = vector.shape_cast %16 : vector<1x32x32xbf16> to vector<32x32xbf16>
    %cst_17 = arith.constant dense<0.000000e+00> : vector<192x32xf32>
    %18 = tpu.matmul %15, %17, %cst_17 {dimension_numbers = #tpu.dot_dimension_numbers<[1], [0], [0], [1], [0, 0, 1, 1], [], []>} : vector<192x32xbf16>, vector<32x32xbf16>, vector<192x32xf32> -> vector<192x32xf32>
    %19 = arith.addf %14, %18 : vector<192x32xf32>
    %c1 = arith.constant 1 : index
    %c0_18 = arith.constant 0 : index
    %20 = vector.load %arg7[%c1, %c0_18] : memref<240x32xbf16, #tpu.memory_space<vmem>>, vector<192x32xbf16>
    %c1_19 = arith.constant 1 : index
    %c0_20 = arith.constant 0 : index
    %c0_21 = arith.constant 0 : index
    %21 = vector.load %arg4[%c1_19, %c0_20, %c0_21] : memref<9x32x32xbf16, #tpu.memory_space<vmem>>, vector<1x32x32xbf16>
    %22 = vector.shape_cast %21 : vector<1x32x32xbf16> to vector<32x32xbf16>
    %cst_22 = arith.constant dense<0.000000e+00> : vector<192x32xf32>
    %23 = tpu.matmul %20, %22, %cst_22 {dimension_numbers = #tpu.dot_dimension_numbers<[1], [0], [0], [1], [0, 0, 1, 1], [], []>} : vector<192x32xbf16>, vector<32x32xbf16>, vector<192x32xf32> -> vector<192x32xf32>
    %24 = arith.addf %19, %23 : vector<192x32xf32>
    %c2 = arith.constant 2 : index
    %c0_23 = arith.constant 0 : index
    %25 = vector.load %arg7[%c2, %c0_23] : memref<240x32xbf16, #tpu.memory_space<vmem>>, vector<192x32xbf16>
    %c2_24 = arith.constant 2 : index
    %c0_25 = arith.constant 0 : index
    %c0_26 = arith.constant 0 : index
    %26 = vector.load %arg4[%c2_24, %c0_25, %c0_26] : memref<9x32x32xbf16, #tpu.memory_space<vmem>>, vector<1x32x32xbf16>
    %27 = vector.shape_cast %26 : vector<1x32x32xbf16> to vector<32x32xbf16>
    %cst_27 = arith.constant dense<0.000000e+00> : vector<192x32xf32>
    %28 = tpu.matmul %25, %27, %cst_27 {dimension_numbers = #tpu.dot_dimension_numbers<[1], [0], [0], [1], [0, 0, 1, 1], [], []>} : vector<192x32xbf16>, vector<32x32xbf16>, vector<192x32xf32> -> vector<192x32xf32>
    %29 = arith.addf %24, %28 : vector<192x32xf32>
    %c16 = arith.constant 16 : index
    %c0_28 = arith.constant 0 : index
    %30 = vector.load %arg7[%c16, %c0_28] : memref<240x32xbf16, #tpu.memory_space<vmem>>, vector<192x32xbf16>
    %c3 = arith.constant 3 : index
    %c0_29 = arith.constant 0 : index
    %c0_30 = arith.constant 0 : index
    %31 = vector.load %arg4[%c3, %c0_29, %c0_30] : memref<9x32x32xbf16, #tpu.memory_space<vmem>>, vector<1x32x32xbf16>
    %32 = vector.shape_cast %31 : vector<1x32x32xbf16> to vector<32x32xbf16>
    %cst_31 = arith.constant dense<0.000000e+00> : vector<192x32xf32>
    %33 = tpu.matmul %30, %32, %cst_31 {dimension_numbers = #tpu.dot_dimension_numbers<[1], [0], [0], [1], [0, 0, 1, 1], [], []>} : vector<192x32xbf16>, vector<32x32xbf16>, vector<192x32xf32> -> vector<192x32xf32>
    %34 = arith.addf %29, %33 : vector<192x32xf32>
    %c17 = arith.constant 17 : index
    %c0_32 = arith.constant 0 : index
    %35 = vector.load %arg7[%c17, %c0_32] : memref<240x32xbf16, #tpu.memory_space<vmem>>, vector<192x32xbf16>
    %c4 = arith.constant 4 : index
    %c0_33 = arith.constant 0 : index
    %c0_34 = arith.constant 0 : index
    %36 = vector.load %arg4[%c4, %c0_33, %c0_34] : memref<9x32x32xbf16, #tpu.memory_space<vmem>>, vector<1x32x32xbf16>
    %37 = vector.shape_cast %36 : vector<1x32x32xbf16> to vector<32x32xbf16>
    %cst_35 = arith.constant dense<0.000000e+00> : vector<192x32xf32>
    %38 = tpu.matmul %35, %37, %cst_35 {dimension_numbers = #tpu.dot_dimension_numbers<[1], [0], [0], [1], [0, 0, 1, 1], [], []>} : vector<192x32xbf16>, vector<32x32xbf16>, vector<192x32xf32> -> vector<192x32xf32>
    %39 = arith.addf %34, %38 : vector<192x32xf32>
    %c18 = arith.constant 18 : index
    %c0_36 = arith.constant 0 : index
    %40 = vector.load %arg7[%c18, %c0_36] : memref<240x32xbf16, #tpu.memory_space<vmem>>, vector<192x32xbf16>
    %c5 = arith.constant 5 : index
    %c0_37 = arith.constant 0 : index
    %c0_38 = arith.constant 0 : index
    %41 = vector.load %arg4[%c5, %c0_37, %c0_38] : memref<9x32x32xbf16, #tpu.memory_space<vmem>>, vector<1x32x32xbf16>
    %42 = vector.shape_cast %41 : vector<1x32x32xbf16> to vector<32x32xbf16>
    %cst_39 = arith.constant dense<0.000000e+00> : vector<192x32xf32>
    %43 = tpu.matmul %40, %42, %cst_39 {dimension_numbers = #tpu.dot_dimension_numbers<[1], [0], [0], [1], [0, 0, 1, 1], [], []>} : vector<192x32xbf16>, vector<32x32xbf16>, vector<192x32xf32> -> vector<192x32xf32>
    %44 = arith.addf %39, %43 : vector<192x32xf32>
    %c32 = arith.constant 32 : index
    %c0_40 = arith.constant 0 : index
    %45 = vector.load %arg7[%c32, %c0_40] : memref<240x32xbf16, #tpu.memory_space<vmem>>, vector<192x32xbf16>
    %c6 = arith.constant 6 : index
    %c0_41 = arith.constant 0 : index
    %c0_42 = arith.constant 0 : index
    %46 = vector.load %arg4[%c6, %c0_41, %c0_42] : memref<9x32x32xbf16, #tpu.memory_space<vmem>>, vector<1x32x32xbf16>
    %47 = vector.shape_cast %46 : vector<1x32x32xbf16> to vector<32x32xbf16>
    %cst_43 = arith.constant dense<0.000000e+00> : vector<192x32xf32>
    %48 = tpu.matmul %45, %47, %cst_43 {dimension_numbers = #tpu.dot_dimension_numbers<[1], [0], [0], [1], [0, 0, 1, 1], [], []>} : vector<192x32xbf16>, vector<32x32xbf16>, vector<192x32xf32> -> vector<192x32xf32>
    %49 = arith.addf %44, %48 : vector<192x32xf32>
    %c33 = arith.constant 33 : index
    %c0_44 = arith.constant 0 : index
    %50 = vector.load %arg7[%c33, %c0_44] : memref<240x32xbf16, #tpu.memory_space<vmem>>, vector<192x32xbf16>
    %c7 = arith.constant 7 : index
    %c0_45 = arith.constant 0 : index
    %c0_46 = arith.constant 0 : index
    %51 = vector.load %arg4[%c7, %c0_45, %c0_46] : memref<9x32x32xbf16, #tpu.memory_space<vmem>>, vector<1x32x32xbf16>
    %52 = vector.shape_cast %51 : vector<1x32x32xbf16> to vector<32x32xbf16>
    %cst_47 = arith.constant dense<0.000000e+00> : vector<192x32xf32>
    %53 = tpu.matmul %50, %52, %cst_47 {dimension_numbers = #tpu.dot_dimension_numbers<[1], [0], [0], [1], [0, 0, 1, 1], [], []>} : vector<192x32xbf16>, vector<32x32xbf16>, vector<192x32xf32> -> vector<192x32xf32>
    %54 = arith.addf %49, %53 : vector<192x32xf32>
    %c34 = arith.constant 34 : index
    %c0_48 = arith.constant 0 : index
    %55 = vector.load %arg7[%c34, %c0_48] : memref<240x32xbf16, #tpu.memory_space<vmem>>, vector<192x32xbf16>
    %c8 = arith.constant 8 : index
    %c0_49 = arith.constant 0 : index
    %c0_50 = arith.constant 0 : index
    %56 = vector.load %arg4[%c8, %c0_49, %c0_50] : memref<9x32x32xbf16, #tpu.memory_space<vmem>>, vector<1x32x32xbf16>
    %57 = vector.shape_cast %56 : vector<1x32x32xbf16> to vector<32x32xbf16>
    %cst_51 = arith.constant dense<0.000000e+00> : vector<192x32xf32>
    %58 = tpu.matmul %55, %57, %cst_51 {dimension_numbers = #tpu.dot_dimension_numbers<[1], [0], [0], [1], [0, 0, 1, 1], [], []>} : vector<192x32xbf16>, vector<32x32xbf16>, vector<192x32xf32> -> vector<192x32xf32>
    %59 = arith.addf %54, %58 : vector<192x32xf32>
    %cst_52 = arith.constant 0.000000e+00 : f32
    %60 = vector.broadcast %cst_52 : f32 to vector<192x32xf32>
    %61 = arith.maximumf %59, %60 : vector<192x32xf32>
    %62 = arith.truncf %61 : vector<192x32xf32> to vector<192x32xbf16>
    %c0_53 = arith.constant 0 : index
    %c0_54 = arith.constant 0 : index
    %c0_55 = arith.constant 0 : index
    %63 = vector.load %arg6[%c0_53, %c0_54, %c0_55] : memref<1x192x32xbf16, #tpu.memory_space<vmem>>, vector<1x192x32xbf16>
    %64 = vector.shape_cast %63 : vector<1x192x32xbf16> to vector<192x32xbf16>
    %65 = vector.shape_cast %62 : vector<192x32xbf16> to vector<1x192x32xbf16>
    tpu.vector_store %arg6[%c0_53, %c0_54, %c0_55], %65 {strides = array<i32>} : memref<1x192x32xbf16, #tpu.memory_space<vmem>>, vector<1x192x32xbf16>,
    return
  }
  func.func @transform_0(%arg0: i32) -> (i32, i32, i32) {
    %c0_i32 = arith.constant 0 : i32
    %c0_i32_0 = arith.constant 0 : i32
    %c0_i32_1 = arith.constant 0 : i32
    return %arg0, %c0_i32, %c0_i32_0 : i32, i32, i32
  }
  func.func @transform_1(%arg0: i32) -> (i32, i32) {
    %c0_i32 = arith.constant 0 : i32
    %c0_i32_0 = arith.constant 0 : i32
    %c0_i32_1 = arith.constant 0 : i32
    return %c0_i32, %c0_i32_0 : i32, i32
  }
  func.func @transform_2(%arg0: i32) -> (i32, i32) {
    %c0_i32 = arith.constant 0 : i32
    %c0_i32_0 = arith.constant 0 : i32
    %c0_i32_1 = arith.constant 0 : i32
    return %c0_i32, %c0_i32_0 : i32, i32
  }
  func.func @transform_3(%arg0: i32) -> (i32, i32, i32) {
    %c0_i32 = arith.constant 0 : i32
    %c0_i32_0 = arith.constant 0 : i32
    %c0_i32_1 = arith.constant 0 : i32
    %c0_i32_2 = arith.constant 0 : i32
    return %c0_i32, %c0_i32_0, %c0_i32_1 : i32, i32, i32
  }
  func.func @transform_4(%arg0: i32) -> (i32, i32) {
    %c0_i32 = arith.constant 0 : i32
    %c0_i32_0 = arith.constant 0 : i32
    %c0_i32_1 = arith.constant 0 : i32
    return %c0_i32, %c0_i32_0 : i32, i32
  }
  func.func @transform_5(%arg0: i32) -> (i32, i32, i32) {
    %c0_i32 = arith.constant 0 : i32
    %c0_i32_0 = arith.constant 0 : i32
    %c0_i32_1 = arith.constant 0 : i32
    return %arg0, %c0_i32, %c0_i32_0 : i32, i32, i32
  }
}

</mosaic_0001>

<bundles_post_ra>
// kernel: block_forward.1
= control target key start
LH: loop header
LB: loop body
LE: loop exit
PB: predicated region body
PF: predicated region fallthrough
CT: control target
= control target key end

     0   :  { %s3716_s18 = smov 0   ;;  %s4679_s0 = inlined_call_operand.vmem [shape: bf16[2,240,128], index: 0, kind: input, shape index: {}]   ;;  %s4680_s1 = inlined_call_operand.vmem [shape: bf16[128,32], index: 1, kind: input, shape index: {}]   ;;  %s4681_s2 = inlined_call_operand.vmem [shape: f32[1,32], index: 2, kind: input, shape index: {}]   ;;  %s4682_s3 = inlined_call_operand.vmem [shape: bf16[9,32,32], index: 3, kind: input, shape index: {}]   ;;  %s4683_s4 = inlined_call_operand.vmem [shape: f32[1,32], index: 4, kind: input, shape index: {}]   ;;  %s4684_s5 = inlined_call_operand.vmem [shape: bf16[2,192,32], index: 5, kind: output, shape index: {}]  }
   0x1 LB: > { %s2940_s19 = sadd.s32 4294967295, %s3684_s18   ;;  %p2944_p0 = scmp.ge.s32.totalorder %s3684_s18, 1  ;;  %s3684_s18 = sphi %s3716_s18, %s15_s18  }
   0x2   : > { %p187_p1 = scmp.lt.s32.totalorder %s3684_s18, 3 }
   0x4   : > { %p188_p2 = pnand %p2944_p0, %p187_p1 }
   0x6   : > { %191 = sbr.rel (%p188_p2) target bundleno = 968 (0x3c8), region = 40 }
   0xb   : > { %v3551_v0 = vld [vmem:[%s4680_s1 + $0x38] sm:$0xff]  ;;  %v3550_v1 = vld [vmem:[%s4680_s1 + $0x30] sm:$0xff]  ;;  %v3549_v2 = vld [vmem:[%s4680_s1 + $0x28] sm:$0xff]  ;;  %p215_p3 = scmp.lt.s32.totalorder %s2940_s19, 1  ;;  %vm558_vm0 = vcmask 257024   ;;  %vm694_vm1 = vcmask 261120  }
   0xc   : > { %414 = vmatpush.bf16.msra.mxu0 %v3551_v0  ;;  %v3548_v3 = vld [vmem:[%s4680_s1 + $0x20] sm:$0xff]  ;;  %v3547_v4 = vld [vmem:[%s4680_s1 + $0x18] sm:$0xff]  ;;  %v3546_v5 = vld [vmem:[%s4680_s1 + $0x10] sm:$0xff]  ;;  %vm917_vm2 = vsmask.f32 7424  ;;  %vm1168_vm3 = vcmask 1046528  }
   0xd   : > { %s4770_s19 = smov (!%p215_p3, %s2940_s19), 1  ;;  %v3545_v6 = vld [vmem:[%s4680_s1 + $0x8] sm:$0xff]  ;;  %v3544_v7 = vld [vmem:[%s4680_s1] sm:$0xff]  ;;  %v3578_v23 = vld [vmem:[%s4682_s3 + $0x18] sm:$0xff] }
   0xe   : > { %s3666_s9 = smul.u32 120, %s4770_s19  ;;  %v3565_v16 = vld [vmem:[%s4682_s3 + $0x8] sm:$0xff]  ;;  %v3564_v17 = vld [vmem:[%s4682_s3] sm:$0xff]  ;;  %1072 = vmatpush.bf16.msra.mxu2 %v3578_v23  ;;  %v3577_v26 = vld [vmem:[%s4682_s3 + $0x10] sm:$0xff] }
   0xf   : > { %737 = vmatpush.bf16.msra.mxu1 %v3565_v16  ;;  %3662 = vmatpush.bf16.msra.mxu3 %v3565_v16  ;;  %v3773_v18 = vld [vmem:[%s4681_s2] ss:$0 sm:$0xff] }
  0x10   : > { %415 = vmatpush.bf16.msra.mxu0 %v3550_v1  ;;  %s3754_s14 = scalar_lea.vmem %s4679_s0, %s3666_s9  ;;  %s3667_s9 = smul.u32 96, %s4770_s19 }
  0x11   : > { %v3529_v8 = vld [vmem:[%s3754_s14] sm:$0xff]  ;;  %v3530_v9 = vld [vmem:[%s3754_s14 + $0x8] sm:$0xff]  ;;  %v3531_v10 = vld [vmem:[%s3754_s14 + $0x10] sm:$0xff] }
  0x12   : > { %v3532_v11 = vld [vmem:[%s3754_s14 + $0x18] sm:$0xff]  ;;  %v3533_v12 = vld [vmem:[%s3754_s14 + $0x20] sm:$0xff]  ;;  %v3534_v13 = vld [vmem:[%s3754_s14 + $0x28] sm:$0xff]  ;;  %1073 = vmatpush.bf16.msra.mxu2 %v3577_v26  ;;  %s4554_s12 = scalar_lea.vmem %s4684_s5, %s3667_s9 }
  0x13   : > { %v3535_v14 = vld [vmem:[%s3754_s14 + $0x30] sm:$0xff]  ;;  %v3536_v15 = vld [vmem:[%s3754_s14 + $0x38] sm:$0xff]  ;;  %738 = vmatpush.bf16.msra.mxu1 %v3564_v17  ;;  %3663 = vmatpush.bf16.msra.mxu3 %v3564_v17  ;;  %v3537_v19 = vld [vmem:[%s3754_s14 + $0x40] sm:$0xff] }
  0x14   : > { %416 = vmatpush.bf16.msra.mxu0 %v3549_v2  ;;  %v3538_v30 = vld [vmem:[%s3754_s14 + $0x48] sm:$0xff]  ;;  %v3539_v40 = vld [vmem:[%s3754_s14 + $0x50] sm:$0xff]  ;;  %v3540_v59 = vld [vmem:[%s3754_s14 + $0x58] sm:$0xff] }
  0x17   : > { %3664 = vmatpush.bf16.msrb.mxu3 %v3578_v23 }
  0x18   : > { %417 = vmatpush.bf16.msra.mxu0 %v3548_v3 }
  0x1b   : > { %3665 = vmatpush.bf16.msrb.mxu3 %v3577_v26 }
  0x1c   : > { %418 = vmatpush.bf16.msra.mxu0 %v3547_v4 }
  0x20   : > { %419 = vmatpush.bf16.msra.mxu0 %v3546_v5 }
  0x24   : > { %420 = vmatpush.bf16.msra.mxu0 %v3545_v6 }
  0x28   : > { %421 = vmatpush.bf16.msra.mxu0 %v3544_v7 }
  0x2b   : > { %422 = vmatmul.bf16.vlgmr.msra.gmra.mxu0 %v3529_v8 }
  0x3b   : > { %427 = vmatmul.bf16.gmra.mxu0 %v3530_v9 }
  0x4b   : > { %432 = vmatmul.bf16.gmra.mxu0 %v3531_v10 }
  0x5b   : > { %437 = vmatmul.bf16.gmra.mxu0 %v3532_v11 }
  0x6b   : > { %442 = vmatmul.bf16.gmra.mxu0 %v3533_v12 }
  0x7b   : > { %447 = vmatmul.bf16.gmra.mxu0 %v3534_v13 }
  0x8b   : > { %452 = vmatmul.bf16.gmra.mxu0 %v3535_v14  ;;  %v3541_v14 = vld [vmem:[%s3754_s14 + $0x60] sm:$0xff] }
  0x9b   : > { %457 = vmatmul.bf16.gmra.mxu0 %v3536_v15 }
  0xa8   : > { %v423_v20 = vpop.f32.mrf.mxu0 }
  0xa9   : > { %v424_v21 = vadd.f32 %v3773_v18, %v423_v20 }
  0xab   : > { %v498_v22 = vmax.f32 %v424_v21, 0.0  ;;  %462 = vmatmul.bf16.gmra.mxu0 %v3537_v19 }
  0xad   : > { %v528_v24 = vpack.c.bf16 %v498_v22, %v498_v22 }
  0xaf   : > { %559 = vst.msk [vmem:[#allocation2] sm:$0xf] %vm558_vm0, %v528_v24 }
  0xb0   : > { %v425_v25 = vpop.f32.mrf.mxu0 }
  0xb1   : > { %v426_v27 = vadd.f32 %v3773_v18, %v425_v25 }
  0xb3   : > { %v499_v28 = vmax.f32 %v426_v27, 0.0 }
  0xb5   : > { %v529_v29 = vpack.c.bf16 %v499_v28, %v499_v28 }
  0xb7   : > { %560 = vst.msk [vmem:[#allocation2 + $0x4] sm:$0xf] %vm558_vm0, %v529_v29 }
  0xb8   : > { %v428_v31 = vpop.f32.mrf.mxu0 }
  0xb9   : > { %v429_v32 = vadd.f32 %v3773_v18, %v428_v31  ;;  %v3623_v31 = vld [vmem:[%s4682_s3 + $0x68] sm:$0xff] }
  0xba   : > { %2217 = vmatpush.bf16.msrb.mxu0 %v3623_v31 }
  0xbb   : > { %v500_v33 = vmax.f32 %v429_v32, 0.0  ;;  %467 = vmatmul.bf16.gmra.mxu0 %v3538_v30 }
  0xbd   : > { %v530_v34 = vpack.c.bf16 %v500_v33, %v500_v33 }
  0xbe   : > { %v3552_v35 = vld [vmem:[#allocation2] sm:$0xff] }
  0xbf   : > { %561 = vst.msk [vmem:[#allocation2 + $0x8] sm:$0xf] %vm558_vm0, %v530_v34  ;;  %3095 = vmatmul.msk.bf16.vlgmr.msra.gmra.mxu1 %vm694_vm1, %v3552_v35  ;;  %v3640_v41 = vld [vmem:[#allocation2] sm:$0xff]  }
  0xc0   : > { %v430_v36 = vpop.f32.mrf.mxu0  ;;  %v921_v44 = vshll.u32 %v3640_v41, 16  ;;  %v919_v51 = vshrl.u32 %v3640_v41, 16 }
  0xc1   : > { %v431_v37 = vadd.f32 %v3773_v18, %v430_v36 }
  0xc2   : > { %v923_v49 = vrot.slane %v921_v44, 1 }
  0xc3   : > { %v501_v38 = vmax.f32 %v431_v37, 0.0 }
  0xc4   : > { %v924_v54 = vor.u32 %v923_v49, %v919_v51 }
  0xc5   : > { %v531_v39 = vpack.c.bf16 %v501_v38, %v501_v38  ;;  %v3622_v38 = vld [vmem:[%s4682_s3 + $0x60] sm:$0xff] }
  0xc6   : > { %2218 = vmatpush.bf16.msrb.mxu0 %v3622_v38 }
  0xc7   : > { %562 = vst.msk [vmem:[#allocation2 + $0xc] sm:$0xf] %vm558_vm0, %v531_v39 }
  0xc8   : > { %v433_v42 = vpop.f32.mrf.mxu0 }
  0xc9   : > { %v434_v43 = vadd.f32 %v3773_v18, %v433_v42 }
  0xcb   : > { %v502_v45 = vmax.f32 %v434_v43, 0.0  ;;  %472 = vmatmul.bf16.gmra.mxu0 %v3539_v40  ;;  %v3542_v40 = vld [vmem:[%s3754_s14 + $0x68] sm:$0xff] }
  0xcd   : > { %v532_v46 = vpack.c.bf16 %v502_v45, %v502_v45 }
  0xce   : > { %v3553_v47 = vld [vmem:[#allocation2 + $0x8] sm:$0xff] }
  0xcf   : > { %v3794_v48 = vld [vmem:[#allocation2 + $0x8] sm:$0xff]  ;;  %563 = vst.msk [vmem:[#allocation2 + $0x10] sm:$0xf] %vm558_vm0, %v532_v46  ;;  %3096 = vmatmul.msk.bf16.gmra.mxu1 %vm694_vm1, %v3553_v47 }
  0xd0   : > { %v435_v50 = vpop.f32.mrf.mxu0  ;;  %v926_v52 = vshll.u32 %v3794_v48, 16  ;;  %v930_v3 = vshrl.u32 %v3794_v48, 16  ;;  %v4686_v5 = vrot.slane %v3794_v48, 1 }
  0xd1   : > { %v436_v53 = vadd.f32 %v3773_v18, %v435_v50 }
  0xd2   : > { %v928_v55 = vrot.slane %v926_v52, 1 }
  0xd3   : > { %v503_v56 = vmax.f32 %v436_v53, 0.0 }
  0xd4   : > { %v929_v57 = vsel %vm917_vm2, %v924_v54, %v928_v55  ;;  %v932_v8 = vor.u32 %v930_v3, %v928_v55 }
  0xd5   : > { %v533_v58 = vpack.c.bf16 %v503_v56, %v503_v56  ;;  %3163 = vmatmul.msk.bf16.vlgmr.msra.gmra.mxu2 %vm694_vm1, %v929_v57 }
  0xd7   : > { %564 = vst.msk [vmem:[#allocation2 + $0x14] sm:$0xf] %vm558_vm0, %v533_v58 }
  0xd8   : > { %v438_v60 = vpop.f32.mrf.mxu0 }
  0xd9   : > { %v439_v61 = vadd.f32 %v3773_v18, %v438_v60 }
  0xdb   : > { %v504_v62 = vmax.f32 %v439_v61, 0.0  ;;  %477 = vmatmul.bf16.gmra.mxu0 %v3540_v59 }
  0xdd   : > { %v534_v63 = vpack.c.bf16 %v504_v62, %v504_v62  ;;  %v3543_v62 = vld [vmem:[%s3754_s14 + $0x70] sm:$0xff] }
  0xde   : > { %v3554_v0 = vld [vmem:[#allocation2 + $0x10] sm:$0xff] }
  0xdf   : > { %v3567_v1 = vld [vmem:[#allocation2 + $0x10] sm:$0xff]  ;;  %565 = vst.msk [vmem:[#allocation2 + $0x18] sm:$0xf] %vm558_vm0, %v534_v63  ;;  %3097 = vmatmul.msk.bf16.gmra.mxu1 %vm694_vm1, %v3554_v0 }
  0xe0   : > { %v440_v2 = vpop.f32.mrf.mxu0  ;;  %v934_v4 = vshll.u32 %v3567_v1, 16  ;;  %v1172_v6 = vrot.slane %v3567_v1, 1  ;;  %v938_v24 = vshrl.u32 %v3567_v1, 16  ;;  %v3824_v26 = vld [vmem:[#allocation2 + $0x10] sm:$0xff] }
  0xe1   : > { %v441_v7 = vadd.f32 %v3773_v18, %v440_v2  ;;  %v4685_v36 = vrot.slane %v3824_v26, 1 }
  0xe2   : > { %v936_v9 = vrot.slane %v934_v4, 1  ;;  %v3813_v10 = vsel %vm1168_vm3, %v4686_v5, %v1172_v6 }
  0xe3   : > { %v505_v11 = vmax.f32 %v441_v7, 0.0 }
  0xe4   : > { %v937_v12 = vsel %vm917_vm2, %v932_v8, %v936_v9  ;;  %v940_v29 = vor.u32 %v938_v24, %v936_v9 }
  0xe5   : > { %v535_v13 = vpack.c.bf16 %v505_v11, %v505_v11  ;;  %3164 = vmatmul.msk.bf16.gmra.mxu2 %vm694_vm1, %v937_v12 }
  0xe7   : > { %566 = vst.msk [vmem:[#allocation2 + $0x1c] sm:$0xf] %vm558_vm0, %v535_v13 }
  0xe8   : > { %v443_v15 = vpop.f32.mrf.mxu0 }
  0xe9   : > { %v444_v16 = vadd.f32 %v3773_v18, %v443_v15 }
  0xeb   : > { %v506_v17 = vmax.f32 %v444_v16, 0.0  ;;  %482 = vmatmul.bf16.gmra.mxu0 %v3541_v14 }
  0xed   : > { %v536_v19 = vpack.c.bf16 %v506_v17, %v506_v17 }
  0xee   : > { %v3555_v20 = vld [vmem:[#allocation2 + $0x18] sm:$0xff] }
  0xef   : > { %v3568_v21 = vld [vmem:[#allocation2 + $0x18] sm:$0xff]  ;;  %567 = vst.msk [vmem:[#allocation2 + $0x20] sm:$0xf] %vm558_vm0, %v536_v19  ;;  %3098 = vmatmul.msk.bf16.gmra.mxu1 %vm694_vm1, %v3555_v20 }
  0xf0   : > { %v3821_v22 = vld [vmem:[#allocation2 + $0x18] sm:$0xff]  ;;  %v445_v23 = vpop.f32.mrf.mxu0  ;;  %v942_v25 = vshll.u32 %v3568_v21, 16  ;;  %v1174_v27 = vrot.slane %v3568_v21, 1  ;;  %v946_v50 = vshrl.u32 %v3568_v21, 16 }
  0xf1   : > { %v446_v28 = vadd.f32 %v3773_v18, %v445_v23  ;;  %v1911_v34 = vrot.slane %v3821_v22, 1  ;;  %v3594_v23 = vld [vmem:[%s4682_s3 + $0x38] sm:$0xff] }
  0xf2   : > { %v944_v30 = vrot.slane %v942_v25, 1  ;;  %v3831_v32 = vsel %vm1168_vm3, %v1172_v6, %v1174_v27  ;;  %1478 = vmatpush.bf16.msrb.mxu1 %v3594_v23 }
  0xf3   : > { %v507_v33 = vmax.f32 %v446_v28, 0.0  ;;  %v3843_v39 = vsel %vm1168_vm3, %v4685_v36, %v1911_v34 }
  0xf4   : > { %v945_v35 = vsel %vm917_vm2, %v940_v29, %v944_v30  ;;  %v948_v54 = vor.u32 %v946_v50, %v944_v30  ;;  %v3593_v29 = vld [vmem:[%s4682_s3 + $0x30] sm:$0xff] }
  0xf5   : > { %v537_v37 = vpack.c.bf16 %v507_v33, %v507_v33  ;;  %3165 = vmatmul.msk.bf16.gmra.mxu2 %vm694_vm1, %v945_v35 }
  0xf6   : > { %1479 = vmatpush.bf16.msrb.mxu1 %v3593_v29 }
  0xf7   : > { %568 = vst.msk [vmem:[#allocation2 + $0x24] sm:$0xf] %vm558_vm0, %v537_v37 }
  0xf8   : > { %v448_v41 = vpop.f32.mrf.mxu0 }
  0xf9   : > { %v449_v42 = vadd.f32 %v3773_v18, %v448_v41 }
  0xfb   : > { %v508_v43 = vmax.f32 %v449_v42, 0.0  ;;  %487 = vmatmul.bf16.gmra.mxu0 %v3542_v40 }
  0xfd   : > { %v538_v44 = vpack.c.bf16 %v508_v43, %v508_v43 }
  0xfe   : > { %v3556_v45 = vld [vmem:[#allocation2 + $0x20] sm:$0xff] }
  0xff   : > { %v3569_v46 = vld [vmem:[#allocation2 + $0x20] sm:$0xff]  ;;  %569 = vst.msk [vmem:[#allocation2 + $0x28] sm:$0xf] %vm558_vm0, %v538_v44  ;;  %3099 = vmatmul.msk.bf16.gmra.mxu1 %vm694_vm1, %v3556_v45 }
 0x100   : > { %v3849_v47 = vld [vmem:[#allocation2 + $0x20] sm:$0xff]  ;;  %v450_v49 = vpop.f32.mrf.mxu0  ;;  %v950_v51 = vshll.u32 %v3569_v46, 16  ;;  %v1176_v52 = vrot.slane %v3569_v46, 1  ;;  %v954_v8 = vshrl.u32 %v3569_v46, 16 }
 0x101   : > { %v451_v53 = vadd.f32 %v3773_v18, %v450_v49  ;;  %v1913_v58 = vrot.slane %v3849_v47, 1 }
 0x102   : > { %v952_v55 = vrot.slane %v950_v51, 1  ;;  %v3854_v56 = vsel %vm1168_vm3, %v1174_v27, %v1176_v52  ;;  %v3610_v27 = vld [vmem:[#allocation2 + $0x10] sm:$0xff] }
 0x103   : > { %v509_v57 = vmax.f32 %v451_v53, 0.0  ;;  %v3860_v61 = vsel %vm1168_vm3, %v1911_v34, %v1913_v58 }
 0x104   : > { %v953_v59 = vsel %vm917_vm2, %v948_v54, %v952_v55  ;;  %v956_v13 = vor.u32 %v954_v8, %v952_v55  ;;  %v3611_v55 = vld [vmem:[#allocation2 + $0x18] sm:$0xff] }
 0x105   : > { %v539_v60 = vpack.c.bf16 %v509_v57, %v509_v57  ;;  %3166 = vmatmul.msk.bf16.gmra.mxu2 %vm694_vm1, %v953_v59 }
 0x107   : > { %570 = vst.msk [vmem:[#allocation2 + $0x2c] sm:$0xf] %vm558_vm0, %v539_v60 }
 0x108   : > { %v453_v63 = vpop.f32.mrf.mxu0 }
 0x109   : > { %v454_v0 = vadd.f32 %v3773_v18, %v453_v63 }
 0x10b   : > { %v510_v1 = vmax.f32 %v454_v0, 0.0  ;;  %492 = vmatmul.bf16.gmra.mxu0 %v3543_v62 }
 0x10d   : > { %v540_v2 = vpack.c.bf16 %v510_v1, %v510_v1 }
 0x10e   : > { %v3557_v3 = vld [vmem:[#allocation2 + $0x28] sm:$0xff] }
 0x10f   : > { %v3570_v4 = vld [vmem:[#allocation2 + $0x28] sm:$0xff]  ;;  %571 = vst.msk [vmem:[#allocation2 + $0x30] sm:$0xf] %vm558_vm0, %v540_v2  ;;  %3100 = vmatmul.msk.bf16.gmra.mxu1 %vm694_vm1, %v3557_v3 }
 0x110   : > { %v3866_v6 = vld [vmem:[#allocation2 + $0x28] sm:$0xff]  ;;  %v455_v7 = vpop.f32.mrf.mxu0  ;;  %v958_v9 = vshll.u32 %v3570_v4, 16  ;;  %v1178_v11 = vrot.slane %v3570_v4, 1  ;;  %v962_v37 = vshrl.u32 %v3570_v4, 16  ;;  %v3606_v4 = vld [vmem:[%s4682_s3 + $0x40] sm:$0xff] }
 0x111   : > { %v456_v12 = vadd.f32 %v3773_v18, %v455_v7  ;;  %v1915_v17 = vrot.slane %v3866_v6, 1 }
 0x112   : > { %v960_v14 = vrot.slane %v958_v9, 1  ;;  %v3871_v15 = vsel %vm1168_vm3, %v1176_v52, %v1178_v11  ;;  %v3607_v52 = vld [vmem:[%s4682_s3 + $0x48] sm:$0xff] }
 0x113   : > { %v511_v16 = vmax.f32 %v456_v12, 0.0  ;;  %v3877_v21 = vsel %vm1168_vm3, %v1913_v58, %v1915_v17  ;;  %1812 = vmatpush.bf16.msrb.mxu2 %v3607_v52 }
 0x114   : > { %v961_v19 = vsel %vm917_vm2, %v956_v13, %v960_v14  ;;  %v964_v42 = vor.u32 %v962_v37, %v960_v14 }
 0x115   : > { %v541_v20 = vpack.c.bf16 %v511_v16, %v511_v16  ;;  %3167 = vmatmul.msk.bf16.gmra.mxu2 %vm694_vm1, %v961_v19 }
 0x117   : > { %572 = vst.msk [vmem:[#allocation2 + $0x34] sm:$0xf] %vm558_vm0, %v541_v20  ;;  %1813 = vmatpush.bf16.msrb.mxu2 %v3606_v4  ;;  %v3612_v20 = vld [vmem:[#allocation2 + $0x20] sm:$0xff] }
 0x118   : > { %v458_v24 = vpop.f32.mrf.mxu0 }
 0x119   : > { %v459_v25 = vadd.f32 %v3773_v18, %v458_v24 }
 0x11b   : > { %v512_v28 = vmax.f32 %v459_v25, 0.0  ;;  %3423 = vmatmul.msk.bf16.vlgmr.msrb.gmra.mxu0 %vm694_vm1, %v3610_v27 }
 0x11d   : > { %v542_v30 = vpack.c.bf16 %v512_v28, %v512_v28  ;;  %v3581_v28 = vld [vmem:[#allocation2 + $0x8] sm:$0xff] }
 0x11e   : > { %v3558_v31 = vld [vmem:[#allocation2 + $0x30] sm:$0xff] }
 0x11f   : > { %v3571_v33 = vld [vmem:[#allocation2 + $0x30] sm:$0xff]  ;;  %573 = vst.msk [vmem:[#allocation2 + $0x38] sm:$0xf] %vm558_vm0, %v542_v30  ;;  %3101 = vmatmul.msk.bf16.gmra.mxu1 %vm694_vm1, %v3558_v31 }
 0x120   : > { %v3889_v34 = vld [vmem:[#allocation2 + $0x30] sm:$0xff]  ;;  %v460_v35 = vpop.f32.mrf.mxu0  ;;  %v966_v38 = vshll.u32 %v3571_v33, 16  ;;  %v1180_v40 = vrot.slane %v3571_v33, 1  ;;  %v970_v0 = vshrl.u32 %v3571_v33, 16 }
 0x121   : > { %v461_v41 = vadd.f32 %v3773_v18, %v460_v35  ;;  %v1917_v46 = vrot.slane %v3889_v34, 1 }
 0x122   : > { %v968_v43 = vrot.slane %v966_v38, 1  ;;  %v3894_v44 = vsel %vm1168_vm3, %v1178_v11, %v1180_v40 }
 0x123   : > { %v513_v45 = vmax.f32 %v461_v41, 0.0  ;;  %v3900_v51 = vsel %vm1168_vm3, %v1915_v17, %v1917_v46 }
 0x124   : > { %v969_v49 = vsel %vm917_vm2, %v964_v42, %v968_v43  ;;  %v972_v7 = vor.u32 %v970_v0, %v968_v43 }
 0x125   : > { %v543_v50 = vpack.c.bf16 %v513_v45, %v513_v45  ;;  %3168 = vmatmul.msk.bf16.gmra.mxu2 %vm694_vm1, %v969_v49 }
 0x127   : > { %574 = vst.msk [vmem:[#allocation2 + $0x3c] sm:$0xf] %vm558_vm0, %v543_v50 }
 0x128   : > { %v463_v53 = vpop.f32.mrf.mxu0 }
 0x129   : > { %v464_v54 = vadd.f32 %v3773_v18, %v463_v53  ;;  %v3654_v53 = vld [vmem:[#allocation2 + $0x8] sm:$0xff]  }
 0x12b   : > { %v514_v57 = vmax.f32 %v464_v54, 0.0  ;;  %3424 = vmatmul.msk.bf16.gmra.mxu0 %vm694_vm1, %v3611_v55 }
 0x12d   : > { %v544_v58 = vpack.c.bf16 %v514_v57, %v514_v57  ;;  %v3613_v57 = vld [vmem:[#allocation2 + $0x28] sm:$0xff] }
 0x12e   : > { %v3559_v59 = vld [vmem:[#allocation2 + $0x38] sm:$0xff] }
 0x12f   : > { %v3572_v60 = vld [vmem:[#allocation2 + $0x38] sm:$0xff]  ;;  %575 = vst.msk [vmem:[#allocation2 + $0x40] sm:$0xf] %vm558_vm0, %v544_v58  ;;  %3102 = vmatmul.msk.bf16.gmra.mxu1 %vm694_vm1, %v3559_v59  ;;  %v1661_v58 = vshll.u32 %v3654_v53, 16 }
 0x130   : > { %v3909_v62 = vld [vmem:[#allocation2 + $0x38] sm:$0xff]  ;;  %v465_v63 = vpop.f32.mrf.mxu0  ;;  %v974_v1 = vshll.u32 %v3572_v60, 16  ;;  %v1182_v2 = vrot.slane %v3572_v60, 1  ;;  %v978_v33 = vshrl.u32 %v3572_v60, 16  ;;  %v1666_v60 = vshll.u32 %v3824_v26, 16 }
 0x131   : > { %v466_v3 = vadd.f32 %v3773_v18, %v465_v63  ;;  %v1919_v12 = vrot.slane %v3909_v62, 1 }
 0x132   : > { %v976_v8 = vrot.slane %v974_v1, 1  ;;  %v3917_v9 = vsel %vm1168_vm3, %v1180_v40, %v1182_v2 }
 0x133   : > { %v515_v11 = vmax.f32 %v466_v3, 0.0  ;;  %v3923_v16 = vsel %vm1168_vm3, %v1917_v46, %v1919_v12  ;;  %v1663_v3 = vrot.slane %v1661_v58, 1 }
 0x134   : > { %v977_v13 = vsel %vm917_vm2, %v972_v7, %v976_v8  ;;  %v980_v40 = vor.u32 %v978_v33, %v976_v8 }
 0x135   : > { %v545_v14 = vpack.c.bf16 %v515_v11, %v515_v11  ;;  %3169 = vmatmul.msk.bf16.gmra.mxu2 %vm694_vm1, %v977_v13  ;;  %v1659_v11 = vshrl.u32 %v3654_v53, 16  ;;  %v1674_v53 = vshll.u32 %v3821_v22, 16 }
 0x137   : > { %576 = vst.msk [vmem:[#allocation2 + $0x44] sm:$0xf] %vm558_vm0, %v545_v14 }
 0x138   : > { %v468_v17 = vpop.f32.mrf.mxu0 }
 0x139   : > { %v469_v19 = vadd.f32 %v3773_v18, %v468_v17  ;;  %v1664_v17 = vor.u32 %v1663_v3, %v1659_v11 }
 0x13b   : > { %v516_v23 = vmax.f32 %v469_v19, 0.0  ;;  %3425 = vmatmul.msk.bf16.gmra.mxu0 %vm694_vm1, %v3612_v20  ;;  %v3969_v20 = vld [vmem:[%s4683_s4] ss:$0 sm:$0xff] }
 0x13c   : > { %v740_v25 = vpop.f32.mrf.mxu1 }
 0x13d   : > { %v546_v24 = vpack.c.bf16 %v516_v23, %v516_v23 }
 0x13e   : > { %v3560_v27 = vld [vmem:[#allocation2 + $0x40] sm:$0xff] }
 0x13f   : > { %v3928_v29 = vld [vmem:[#allocation2 + $0x40] sm:$0xff]  ;;  %577 = vst.msk [vmem:[#allocation2 + $0x48] sm:$0xf] %vm558_vm0, %v546_v24  ;;  %3103 = vmatmul.msk.bf16.vlgmr.msra.gmra.mxu3 %vm694_vm1, %v3560_v27  ;;  %3259 = vmatmul.msk.bf16.vlgmr.msrb.gmra.mxu1 %vm694_vm1, %v3581_v28 }
 0x140   : > { %v3931_v30 = vld [vmem:[#allocation2 + $0x40] sm:$0xff]  ;;  %v470_v31 = vpop.f32.mrf.mxu0  ;;  %v982_v35 = vshll.u32 %v3928_v29, 16  ;;  %v1184_v37 = vrot.slane %v3928_v29, 1 }
 0x141   : > { %v471_v38 = vadd.f32 %v3773_v18, %v470_v31  ;;  %v1921_v45 = vrot.slane %v3931_v30, 1 }
 0x142   : > { %v3938_v41 = vrot.slane %v982_v35, 1  ;;  %v3941_v42 = vsel %vm1168_vm3, %v1182_v2, %v1184_v37  ;;  %v3582_v2 = vld [vmem:[#allocation2 + $0x10] sm:$0xff]  ;;  %v800_v35 = vadd.f32 %v3969_v20, %v740_v25 }
 0x143   : > { %v517_v43 = vmax.f32 %v471_v38, 0.0  ;;  %v3948_v52 = vsel %vm1168_vm3, %v1919_v12, %v1921_v45  ;;  %v1668_v12 = vrot.slane %v1666_v60, 1 }
 0x144   : > { %v985_v46 = vsel %vm917_vm2, %v980_v40, %v3938_v41  ;;  %v742_v50 = vpop.f32.mrf.mxu1 }
 0x145   : > { %v547_v49 = vpack.c.bf16 %v517_v43, %v517_v43  ;;  %3170 = vmatmul.msk.bf16.gmra.mxu2 %vm694_vm1, %v985_v46  ;;  %v1669_v27 = vsel %vm917_vm2, %v1664_v17, %v1668_v12  ;;  %v3614_v46 = vld [vmem:[#allocation2 + $0x30] sm:$0xff]  ;;  %v801_v58 = vadd.f32 %v3969_v20, %v742_v50 }
 0x147   : > { %578 = vst.msk [vmem:[#allocation2 + $0x4c] sm:$0xf] %vm558_vm0, %v547_v49 }
 0x148   : > { %v473_v54 = vpop.f32.mrf.mxu0 }
 0x149   : > { %v474_v55 = vadd.f32 %v3773_v18, %v473_v54 }
 0x14b   : > { %v518_v59 = vmax.f32 %v474_v55, 0.0  ;;  %3426 = vmatmul.msk.bf16.gmra.mxu0 %vm694_vm1, %v3613_v57  ;;  %v3583_v57 = vld [vmem:[#allocation2 + $0x18] sm:$0xff] }
 0x14c   : > { %v745_v0 = vpop.f32.mrf.mxu1 }
 0x14d   : > { %v548_v63 = vpack.c.bf16 %v518_v59, %v518_v59 }
 0x14e   : > { %v3561_v1 = vld [vmem:[#allocation2 + $0x48] sm:$0xff] }
 0x14f   : > { %v3954_v4 = vld [vmem:[#allocation2 + $0x48] sm:$0xff]  ;;  %579 = vst.msk [vmem:[#allocation2 + $0x50] sm:$0xf] %vm558_vm0, %v548_v63  ;;  %3104 = vmatmul.msk.bf16.gmra.mxu3 %vm694_vm1, %v3561_v1  ;;  %3260 = vmatmul.msk.bf16.gmra.mxu1 %vm694_vm1, %v3582_v2  ;;  %v1670_v1 = vshrl.u32 %v3824_v26, 16  ;;  %v1676_v2 = vrot.slane %v1674_v53, 1  ;;  %v3615_v53 = vld [vmem:[#allocation2 + $0x38] sm:$0xff] }
 0x150   : > { %v3957_v7 = vld [vmem:[#allocation2 + $0x48] sm:$0xff]  ;;  %v475_v8 = vpop.f32.mrf.mxu0  ;;  %v1186_v13 = vrot.slane %v3954_v4, 1 }
 0x151   : > { %v476_v14 = vadd.f32 %v3773_v18, %v475_v8  ;;  %v1923_v24 = vrot.slane %v3957_v7, 1  ;;  %v1672_v50 = vor.u32 %v1670_v1, %v1668_v12  ;;  %v3580_v12 = vld [vmem:[%s4682_s3 + $0x28] sm:$0xff] }
 0x152   : > { %v3964_v19 = vsel %vm1168_vm3, %v1184_v37, %v1186_v13  ;;  %1248 = vmatpush.bf16.msra.mxu3 %v3580_v12 }
 0x153   : > { %v519_v23 = vmax.f32 %v476_v14, 0.0  ;;  %v3975_v33 = vsel %vm1168_vm3, %v1921_v45, %v1923_v24 }
 0x154   : > { %v747_v31 = vpop.f32.mrf.mxu1 }
 0x155   : > { %v549_v28 = vpack.c.bf16 %v519_v23, %v519_v23  ;;  %3327 = vmatmul.msk.bf16.vlgmr.msrb.gmra.mxu2 %vm694_vm1, %v1669_v27  ;;  %v1677_v27 = vsel %vm917_vm2, %v1672_v50, %v1676_v2 }
 0x157   : > { %580 = vst.msk [vmem:[#allocation2 + $0x54] sm:$0xf] %vm558_vm0, %v549_v28 }
 0x158   : > { %v478_v37 = vpop.f32.mrf.mxu0  ;;  %v1075_v38 = vpop.f32.mrf.mxu2 }
 0x159   : > { %v479_v40 = vadd.f32 %v3773_v18, %v478_v37  ;;  %v3980_v43 = vadd.f32 %v1075_v38, %v800_v35  ;;  %v802_v38 = vadd.f32 %v3969_v20, %v745_v0 }
 0x15b   : > { %v520_v49 = vmax.f32 %v479_v40, 0.0  ;;  %3427 = vmatmul.msk.bf16.gmra.mxu0 %vm694_vm1, %v3614_v46 }
 0x15c   : > { %v3984_v55 = vpop.f32.mrf.mxu1 }
 0x15d   : > { %v550_v54 = vpack.c.bf16 %v520_v49, %v520_v49 }
 0x15e   : > { %v3562_v45 = vld [vmem:[#allocation2 + $0x50] sm:$0xff] }
 0x15f   : > { %v3986_v25 = vld [vmem:[#allocation2 + $0x50] sm:$0xff]  ;;  %581 = vst.msk [vmem:[#allocation2 + $0x58] sm:$0xf] %vm558_vm0, %v550_v54  ;;  %3105 = vmatmul.msk.bf16.gmra.mxu3 %vm694_vm1, %v3562_v45  ;;  %3261 = vmatmul.msk.bf16.gmra.mxu1 %vm694_vm1, %v3583_v57 }
 0x160   : > { %v3990_v59 = vld [vmem:[#allocation2 + $0x50] sm:$0xff]  ;;  %v480_v60 = vpop.f32.mrf.mxu0  ;;  %v1077_v63 = vpop.f32.mrf.mxu2  ;;  %v1188_v3 = vrot.slane %v3986_v25, 1 }
 0x161   : > { %v481_v8 = vadd.f32 %v3773_v18, %v480_v60  ;;  %v3997_v11 = vadd.f32 %v1077_v63, %v801_v58  ;;  %v1925_v23 = vrot.slane %v3990_v59, 1  ;;  %v3584_v58 = vld [vmem:[#allocation2 + $0x20] sm:$0xff]  ;;  %v803_v63 = vadd.f32 %v3969_v20, %v747_v31 }
 0x162   : > { %v4000_v14 = vsel %vm1168_vm3, %v1186_v13, %v1188_v3 }
 0x163   : > { %v521_v17 = vmax.f32 %v481_v8, 0.0  ;;  %v4008_v37 = vsel %vm1168_vm3, %v1923_v24, %v1925_v23  ;;  %v1682_v24 = vshll.u32 %v3849_v47, 16 }
 0x164   : > { %v4004_v35 = vpop.f32.mrf.mxu1  ;;  %4687 = vst [vmem:[#allocation3_spill] sm:$0xff] %v4008_v37  ;;  %v3586_v37 = vld [vmem:[#allocation2 + $0x30] sm:$0xff] }
 0x165   : > { %v551_v28 = vpack.c.bf16 %v521_v17, %v521_v17  ;;  %3328 = vmatmul.msk.bf16.gmra.mxu2 %vm694_vm1, %v1677_v27  ;;  %v1678_v17 = vshrl.u32 %v3821_v22, 16  ;;  %v1684_v27 = vrot.slane %v1682_v24, 1 }
 0x167   : > { %582 = vst.msk [vmem:[#allocation2 + $0x5c] sm:$0xf] %vm558_vm0, %v551_v28  ;;  %v1680_v31 = vor.u32 %v1678_v17, %v1676_v2  ;;  %v804_v2 = vadd.f32 %v3969_v20, %v3984_v55  ;;  %v3616_v17 = vld [vmem:[#allocation2 + $0x40] sm:$0xff] }
 0x168   : > { %v483_v13 = vpop.f32.mrf.mxu0  ;;  %v1080_v40 = vpop.f32.mrf.mxu2 }
 0x169   : > { %v484_v46 = vadd.f32 %v3773_v18, %v483_v13  ;;  %v4016_v49 = vadd.f32 %v1080_v40, %v802_v38 }
 0x16b   : > { %v522_v54 = vmax.f32 %v484_v46, 0.0  ;;  %3428 = vmatmul.msk.bf16.gmra.mxu0 %vm694_vm1, %v3615_v53  ;;  %v1685_v53 = vsel %vm917_vm2, %v1680_v31, %v1684_v27 }
 0x16c   : > { %v4020_v45 = vpop.f32.mrf.mxu1 }
 0x16d   : > { %v552_v0 = vpack.c.bf16 %v522_v54, %v522_v54 }
 0x16e   : > { %v3563_v57 = vld [vmem:[#allocation2 + $0x58] sm:$0xff] }
 0x16f   : > { %v4022_v60 = vld [vmem:[#allocation2 + $0x58] sm:$0xff]  ;;  %583 = vst.msk [vmem:[#allocation2 + $0x60] sm:$0xf] %vm558_vm0, %v552_v0  ;;  %3106 = vmatmul.msk.bf16.gmra.mxu3 %vm694_vm1, %v3563_v57  ;;  %3262 = vmatmul.msk.bf16.gmra.mxu1 %vm694_vm1, %v3584_v58 }
 0x170   : > { %v4026_v1 = vld [vmem:[#allocation2 + $0x58] sm:$0xff]  ;;  %v485_v8 = vpop.f32.mrf.mxu0  ;;  %v1082_v50 = vpop.f32.mrf.mxu2  ;;  %v1190_v28 = vrot.slane %v4022_v60, 1 }
 0x171   : > { %v486_v38 = vadd.f32 %v3773_v18, %v485_v8  ;;  %v4033_v12 = vadd.f32 %v1082_v50, %v803_v63  ;;  %v1927_v46 = vrot.slane %v4026_v1, 1 }
 0x172   : > { %v4036_v13 = vsel %vm1168_vm3, %v1188_v3, %v1190_v28  ;;  %v990_v3 = vshll.u32 %v3954_v4, 16 }
 0x173   : > { %v523_v40 = vmax.f32 %v486_v38, 0.0  ;;  %v4044_v24 = vsel %vm1168_vm3, %v1925_v23, %v1927_v46  ;;  %v986_v23 = vshrl.u32 %v3928_v29, 16 }
 0x174   : > { %v4040_v0 = vpop.f32.mrf.mxu1  ;;  %4688 = vst [vmem:[#allocation4_spill] sm:$0xff] %v4044_v24  ;;  %v992_v55 = vrot.slane %v990_v3, 1 }
 0x175   : > { %v553_v54 = vpack.c.bf16 %v523_v40, %v523_v40  ;;  %3329 = vmatmul.msk.bf16.gmra.mxu2 %vm694_vm1, %v1685_v53  ;;  %v1690_v53 = vshll.u32 %v3866_v6, 16  ;;  %v988_v36 = vor.u32 %v986_v23, %v3938_v41  ;;  %v1686_v41 = vshrl.u32 %v3849_v47, 16 }
 0x176   : > { %v848_v22 = vld [vmem:[#allocation2 + $0x60] sm:$0x1] }
 0x177   : > { %584 = vst.msk [vmem:[#allocation2 + $0x64] sm:$0xf] %vm558_vm0, %v553_v54  ;;  %v903_v57 = vunpack.c.l.b16 %v848_v22  ;;  %v993_v29 = vsel %vm917_vm2, %v988_v36, %v992_v55  ;;  %v1688_v36 = vor.u32 %v1686_v41, %v1684_v27 }
 0x178   : > { %v488_v58 = vpop.f32.mrf.mxu0  ;;  %v1085_v63 = vpop.f32.mrf.mxu2 }
 0x179   : > { %v489_v8 = vadd.f32 %v3773_v18, %v488_v58  ;;  %v4051_v50 = vadd.f32 %v1085_v63, %v804_v2  ;;  %v4053_v38 = vpack.c.b16 %v903_v57, %v903_v57  ;;  %v3585_v58 = vld [vmem:[#allocation2 + $0x28] sm:$0xff]  ;;  %v805_v63 = vadd.f32 %v3969_v20, %v4004_v35  ;;  %v3579_v35 = vld [vmem:[%s4682_s3 + $0x20] sm:$0xff] }
 0x17a   : > { %1249 = vmatpush.bf16.msra.mxu3 %v3579_v35  ;;  %v3617_v35 = vld [vmem:[#allocation2 + $0x48] sm:$0xff] }
 0x17b   : > { %v524_v31 = vmax.f32 %v489_v8, 0.0  ;;  %3429 = vmatmul.msk.bf16.gmra.mxu0 %vm694_vm1, %v3616_v17  ;;  %v1192_v40 = vrot.slane %v4053_v38, 1 }
 0x17c   : > { %v760_v22 = vpop.f32.mrf.mxu1 }
 0x17d   : > { %v554_v54 = vpack.c.bf16 %v524_v31, %v524_v31  ;;  %v4061_v2 = vsel %vm1168_vm3, %v1190_v28, %v1192_v40  ;;  %v1692_v28 = vrot.slane %v1690_v53, 1 }
 0x17e   : > { %v4063_v57 = vld [vmem:[#allocation2 + $0x60] sm:$0xff] }
 0x17f   : > { %585 = vst.msk [vmem:[#allocation2 + $0x68] sm:$0xf] %vm558_vm0, %v554_v54  ;;  %3171 = vmatmul.msk.bf16.vlgmr.msrb.gmra.mxu3 %vm694_vm1, %v993_v29  ;;  %3263 = vmatmul.msk.bf16.gmra.mxu1 %vm694_vm1, %v3585_v58  ;;  %v1929_v17 = vrot.slane %v4063_v57, 1  ;;  %v1693_v58 = vsel %vm917_vm2, %v1688_v36, %v1692_v28 }
 0x180   : > { %v490_v3 = vpop.f32.mrf.mxu0  ;;  %v1087_v8 = vpop.f32.mrf.mxu2 }
 0x181   : > { %v491_v31 = vadd.f32 %v3773_v18, %v490_v3  ;;  %v4074_v23 = vadd.f32 %v1087_v8, %v805_v63  ;;  %v4080_v40 = vsel %vm1168_vm3, %v1927_v46, %v1929_v17  ;;  %v806_v63 = vadd.f32 %v3969_v20, %v4020_v45 }
 0x182   : > { %4689 = vst [vmem:[#allocation5_spill] sm:$0xff] %v4080_v40  ;;  %v998_v3 = vshll.u32 %v3986_v25, 16 }
 0x183   : > { %v525_v54 = vmax.f32 %v491_v31, 0.0 }
 0x184   : > { %v762_v53 = vpop.f32.mrf.mxu1  ;;  %v1000_v45 = vrot.slane %v998_v3, 1 }
 0x185   : > { %v555_v47 = vpack.c.bf16 %v525_v54, %v525_v54  ;;  %3330 = vmatmul.msk.bf16.gmra.mxu2 %vm694_vm1, %v1693_v58  ;;  %v994_v58 = vshrl.u32 %v3954_v4, 16 }
 0x186   : > { %v1589_v29 = vld [vmem:[#allocation2 + $0x68] sm:$0x1] }
 0x187   : > { %586 = vst.msk [vmem:[#allocation2 + $0x6c] sm:$0xf] %vm558_vm0, %v555_v47  ;;  %v1644_v27 = vunpack.c.l.b16 %v1589_v29  ;;  %v1698_v47 = vshll.u32 %v3889_v34, 16  ;;  %v996_v40 = vor.u32 %v994_v58, %v992_v55  ;;  %v1694_v55 = vshrl.u32 %v3866_v6, 16  ;;  %v3618_v58 = vld [vmem:[#allocation2 + $0x50] sm:$0xff] }
 0x188   : > { %v493_v8 = vpop.f32.mrf.mxu0  ;;  %v1090_v46 = vpop.f32.mrf.mxu2  ;;  %v1002_v6 = vshrl.u32 %v3986_v25, 16  ;;  %v3609_v25 = vld [vmem:[%s4682_s3 + $0x58] sm:$0xff] }
 0x189   : > { %v494_v41 = vadd.f32 %v3773_v18, %v493_v8  ;;  %v4089_v31 = vadd.f32 %v1090_v46, %v806_v63  ;;  %v4091_v36 = vpack.c.b16 %v1644_v27, %v1644_v27  ;;  %v807_v63 = vadd.f32 %v3969_v20, %v4040_v0  ;;  %1987 = vmatpush.bf16.msrb.mxu3 %v3609_v25 }
 0x18a   : > { %v1001_v27 = vsel %vm917_vm2, %v996_v40, %v1000_v45  ;;  %v1700_v8 = vrot.slane %v1698_v47, 1  ;;  %v808_v0 = vadd.f32 %v3969_v20, %v760_v22  ;;  %v1006_v40 = vshll.u32 %v4022_v60, 16 }
 0x18b   : > { %v526_v54 = vmax.f32 %v494_v41, 0.0  ;;  %3430 = vmatmul.msk.bf16.gmra.mxu0 %vm694_vm1, %v3617_v35  ;;  %v1931_v5 = vrot.slane %v4091_v36, 1  ;;  %v1004_v47 = vor.u32 %v1002_v6, %v1000_v45  ;;  %v1010_v6 = vshrl.u32 %v4022_v60, 16 }
 0x18c   : > { %v765_v24 = vpop.f32.mrf.mxu1 }
 0x18d   : > { %v556_v29 = vpack.c.bf16 %v526_v54, %v526_v54  ;;  %v4098_v18 = vsel %vm1168_vm3, %v1929_v17, %v1931_v5  ;;  %v1696_v5 = vor.u32 %v1694_v55, %v1692_v28  ;;  %v1706_v28 = vshll.u32 %v3909_v62, 16 }
 0x18e   : > { %4690 = vst [vmem:[#allocation6_spill] sm:$0xff] %v4098_v18  ;;  %v1754_v18 = vshll.u32 %v4091_v36, 16 }
 0x18f   : > { %587 = vst.msk [vmem:[#allocation2 + $0x70] sm:$0xf] %vm558_vm0, %v556_v29  ;;  %3172 = vmatmul.msk.bf16.gmra.mxu3 %vm694_vm1, %v1001_v27  ;;  %3264 = vmatmul.msk.bf16.gmra.mxu1 %vm694_vm1, %v3586_v37  ;;  %v1701_v17 = vsel %vm917_vm2, %v1696_v5, %v1700_v8  ;;  %v1008_v37 = vrot.slane %v1006_v40, 1  ;;  %v3587_v29 = vld [vmem:[#allocation2 + $0x38] sm:$0xff] }
 0x190   : > { %v495_v4 = vpop.f32.mrf.mxu0  ;;  %v1092_v3 = vpop.f32.mrf.mxu2 }
 0x191   : > { %v4107_v46 = vadd.f32 %v1092_v3, %v807_v63  ;;  %v809_v63 = vadd.f32 %v3969_v20, %v762_v53  ;;  %v1009_v22 = vsel %vm917_vm2, %v1004_v47, %v1008_v37  ;;  %v1702_v4 = vshrl.u32 %v3889_v34, 16 }
 0x192   : > { %v1708_v3 = vrot.slane %v1706_v28, 1  ;;  %v810_v34 = vadd.f32 %v3969_v20, %v765_v24  ;;  %v1714_v24 = vshll.u32 %v3931_v30, 16 }
 0x193   : > { %v1704_v5 = vor.u32 %v1702_v4, %v1700_v8  ;;  %v3636_v8 = vld [vmem:[%s4682_s3 + $0x78] sm:$0xff]  ;;  %v1710_v4 = vshrl.u32 %v3909_v62, 16  ;;  %v1722_v62 = vshll.u32 %v3957_v7, 16 }
 0x194   : > { %v767_v41 = vpop.f32.mrf.mxu1  ;;  %2551 = vmatpush.bf16.msra.mxu1 %v3636_v8  ;;  %v1716_v25 = vrot.slane %v1714_v24, 1  ;;  %v4691_v24 = vrot.slane %v3794_v48, 1 }
 0x195   : > { %3331 = vmatmul.msk.bf16.gmra.mxu2 %vm694_vm1, %v1701_v17  ;;  %v1709_v53 = vsel %vm917_vm2, %v1704_v5, %v1708_v3  ;;  %v3638_v17 = vld [vmem:[%s4682_s3 + $0x88] sm:$0xff]  ;;  %v1712_v5 = vor.u32 %v1710_v4, %v1708_v3 }
 0x196   : > { %2726 = vmatpush.bf16.msra.mxu2 %v3638_v17  ;;  %v3651_v17 = vld [vmem:[#allocation2] sm:$0xf0]  ;;  %v3589_v3 = vld [vmem:[#allocation2 + $0x48] sm:$0xff] }
 0x198   : > { %v1095_v35 = vpop.f32.mrf.mxu2 }
 0x199   : > { %v4113_v54 = vadd.f32 %v1095_v35, %v808_v0  ;;  %v1014_v0 = vshll.u32 %v4053_v38, 16  ;;  %v3588_v38 = vld [vmem:[#allocation2 + $0x40] sm:$0xff] }
 0x19b   : > { %3431 = vmatmul.msk.bf16.gmra.mxu0 %vm694_vm1, %v3618_v58  ;;  %v3619_v58 = vld [vmem:[#allocation2 + $0x58] sm:$0xff]  ;;  %v1016_v28 = vrot.slane %v1014_v0, 1  ;;  %v3652_v0 = vld [vmem:[#allocation2] sm:$0xe] }
 0x19c   : > { %v770_v45 = vpop.f32.mrf.mxu1  ;;  %v3653_v8 = vor.u32 %v3652_v0, %v3651_v17  ;;  %v3590_v0 = vld [vmem:[#allocation2 + $0x50] sm:$0xff] }
 0x19f   : > { %3173 = vmatmul.msk.bf16.gmra.mxu3 %vm694_vm1, %v1009_v22  ;;  %3265 = vmatmul.msk.bf16.gmra.mxu1 %vm694_vm1, %v3587_v29  ;;  %v1012_v29 = vor.u32 %v1010_v6, %v1008_v37  ;;  %v1169_v6 = vrot.slane %v3653_v8, 1 }
 0x1a0   : > { %v1097_v27 = vpop.f32.mrf.mxu2 }
 0x1a1   : > { %v4123_v55 = vadd.f32 %v1097_v27, %v809_v63  ;;  %v811_v63 = vadd.f32 %v3969_v20, %v767_v41  ;;  %v1017_v22 = vsel %vm917_vm2, %v1012_v29, %v1016_v28  ;;  %v812_v41 = vadd.f32 %v3969_v20, %v770_v45 }
 0x1a2   : > { %v1171_v29 = vsel %vm1168_vm3, %v1169_v6, %v4691_v24 }
 0x1a4   : > { %v772_v47 = vpop.f32.mrf.mxu1 }
 0x1a5   : > { %3332 = vmatmul.msk.bf16.gmra.mxu2 %vm694_vm1, %v1709_v53  ;;  %v1717_v53 = vsel %vm917_vm2, %v1712_v5, %v1716_v25  ;;  %v813_v28 = vadd.f32 %v3969_v20, %v772_v47 }
 0x1a8   : > { %v1100_v40 = vpop.f32.mrf.mxu2 }
 0x1a9   : > { %v4135_v35 = vadd.f32 %v1100_v40, %v810_v34 }
 0x1ab   : > { %3432 = vmatmul.msk.bf16.gmra.mxu0 %vm694_vm1, %v3619_v58  ;;  %v3620_v58 = vld [vmem:[#allocation2 + $0x60] sm:$0xff] }
 0x1ac   : > { %v775_v37 = vpop.f32.mrf.mxu1 }
 0x1ad   : > { %v814_v48 = vadd.f32 %v3969_v20, %v775_v37  ;;  %v1726_v37 = vshrl.u32 %v3957_v7, 16  ;;  %v3635_v7 = vld [vmem:[%s4682_s3 + $0x70] sm:$0xff] }
 0x1ae   : > { %2552 = vmatpush.bf16.msra.mxu1 %v3635_v7 }
 0x1af   : > { %3174 = vmatmul.msk.bf16.gmra.mxu3 %vm694_vm1, %v1017_v22  ;;  %3266 = vmatmul.msk.bf16.gmra.mxu1 %vm694_vm1, %v3588_v38  ;;  %v1724_v22 = vrot.slane %v1722_v62, 1 }
 0x1b0   : > { %v1102_v27 = vpop.f32.mrf.mxu2 }
 0x1b1   : > { %v4148_v60 = vadd.f32 %v1102_v27, %v811_v63  ;;  %v1718_v63 = vshrl.u32 %v3931_v30, 16  ;;  %v1730_v30 = vshll.u32 %v3990_v59, 16  ;;  %v1728_v6 = vor.u32 %v1726_v37, %v1724_v22 }
 0x1b3   : > { %v1720_v4 = vor.u32 %v1718_v63, %v1716_v25  ;;  %v1732_v8 = vrot.slane %v1730_v30, 1 }
 0x1b4   : > { %v777_v38 = vpop.f32.mrf.mxu1 }
 0x1b5   : > { %3333 = vmatmul.msk.bf16.gmra.mxu2 %vm694_vm1, %v1717_v53  ;;  %v1725_v47 = vsel %vm917_vm2, %v1720_v4, %v1724_v22  ;;  %v815_v25 = vadd.f32 %v3969_v20, %v777_v38  ;;  %v1733_v24 = vsel %vm917_vm2, %v1728_v6, %v1732_v8  ;;  %v1734_v22 = vshrl.u32 %v3990_v59, 16 }
 0x1b6   : > { %v1742_v59 = vshrl.u32 %v4026_v1, 16 }
 0x1b8   : > { %v1105_v34 = vpop.f32.mrf.mxu2 }
 0x1b9   : > { %v4153_v40 = vadd.f32 %v1105_v34, %v812_v41 }
 0x1bb   : > { %3433 = vmatmul.msk.bf16.gmra.mxu0 %vm694_vm1, %v3620_v58 }
 0x1bc   : > { %v4173_v41 = vpop.f32.mrf.mxu1 }
 0x1bf   : > { %3187 = vmatmul.msk.bf16.vlgmr.msra.gmra.mxu3 %vm694_vm1, %v1171_v29  ;;  %3267 = vmatmul.msk.bf16.gmra.mxu1 %vm694_vm1, %v3589_v3 }
 0x1c0   : > { %v1107_v45 = vpop.f32.mrf.mxu2 }
 0x1c1   : > { %v4164_v27 = vadd.f32 %v1107_v45, %v813_v28  ;;  %v3591_v45 = vld [vmem:[#allocation2 + $0x58] sm:$0xff] }
 0x1c2   : > { %v4166_v5 = vpop.f32.mrf.mxu3 }
 0x1c4   : > { %v4187_v28 = vpop.f32.mrf.mxu1 }
 0x1c5   : > { %3334 = vmatmul.msk.bf16.gmra.mxu2 %vm694_vm1, %v1725_v47  ;;  %v1736_v47 = vor.u32 %v1734_v22, %v1732_v8  ;;  %v3637_v8 = vld [vmem:[%s4682_s3 + $0x80] sm:$0xff]  ;;  %v4229_v22 = vld [vmem:[#allocation2 + $0x18] sm:$0xff] }
 0x1c6   : > { %2727 = vmatpush.bf16.msra.mxu2 %v3637_v8  ;;  %v1750_v8 = vshrl.u32 %v4063_v57, 16 }
 0x1c8   : > { %v1110_v53 = vpop.f32.mrf.mxu2 }
 0x1c9   : > { %v4171_v17 = vadd.f32 %v1110_v53, %v814_v48 }
 0x1ca   : > { %v4175_v34 = vpop.f32.mrf.mxu3 }
 0x1cc   : > { %v4197_v38 = vpop.f32.mrf.mxu1 }
 0x1cf   : > { %3188 = vmatmul.msk.bf16.gmra.mxu3 %vm694_vm1, %v3813_v10  ;;  %3268 = vmatmul.msk.bf16.gmra.mxu1 %vm694_vm1, %v3590_v0  ;;  %v1738_v10 = vshll.u32 %v4026_v1, 16 }
 0x1d0   : > { %v1112_v58 = vpop.f32.mrf.mxu2 }
 0x1d1   : > { %v4183_v62 = vadd.f32 %v1112_v58, %v815_v25  ;;  %v1740_v4 = vrot.slane %v1738_v10, 1  ;;  %v3592_v58 = vld [vmem:[#allocation2 + $0x60] sm:$0xff]  ;;  %v3658_v10 = vld [vmem:[#allocation2 + $0x10] sm:$0xff]  }
 0x1d2   : > { %v4185_v3 = vpop.f32.mrf.mxu3  ;;  %v2400_v1 = vshll.u32 %v3658_v10, 16 }
 0x1d3   : > { %v1741_v53 = vsel %vm917_vm2, %v1736_v47, %v1740_v4  ;;  %v2405_v47 = vshll.u32 %v4229_v22, 16 }
 0x1d4   : > { %v4209_v30 = vpop.f32.mrf.mxu1 }
 0x1d5   : > { %3335 = vmatmul.msk.bf16.gmra.mxu2 %vm694_vm1, %v1733_v24  ;;  %4692 = vst [vmem:[#allocation7_spill] sm:$0xff] %v4209_v30  ;;  %v1744_v24 = vor.u32 %v1742_v59, %v1740_v4  ;;  %v2407_v4 = vrot.slane %v2405_v47, 1  ;;  %v4251_v47 = vld [vmem:[#allocation2 + $0x20] sm:$0xff] }
 0x1d8   : > { %v4199_v63 = vpop.f32.mrf.mxu2 }
 0x1da   : > { %v4191_v29 = vpop.f32.mrf.mxu3 }
 0x1dc   : > { %v4223_v6 = vpop.f32.mrf.mxu1 }
 0x1dd   : > { %4693 = vst [vmem:[#allocation8_spill] sm:$0xff] %v4223_v6 }
 0x1df   : > { %3189 = vmatmul.msk.bf16.gmra.mxu3 %vm694_vm1, %v3831_v32  ;;  %3269 = vmatmul.msk.bf16.gmra.mxu1 %vm694_vm1, %v3591_v45  ;;  %v1746_v32 = vshll.u32 %v4063_v57, 16  ;;  %v816_v57 = vadd.f32 %v3969_v20, %v4166_v5 }
 0x1e0   : > { %v4211_v0 = vpop.f32.mrf.mxu2 }
 0x1e1   : > { %v1748_v37 = vrot.slane %v1746_v32, 1 }
 0x1e2   : > { %v4205_v48 = vpop.f32.mrf.mxu3 }
 0x1e4   : > { %v4236_v59 = vpop.f32.mrf.mxu1 }
 0x1e5   : > { %3336 = vmatmul.msk.bf16.gmra.mxu2 %vm694_vm1, %v1741_v53  ;;  %v2402_v53 = vrot.slane %v2400_v1, 1  ;;  %4694 = vst [vmem:[#allocation9_spill] sm:$0xff] %v4236_v59  ;;  %v1756_v1 = vrot.slane %v1754_v18, 1 }
 0x1e8   : > { %v4225_v7 = vpop.f32.mrf.mxu2 }
 0x1ea   : > { %v4213_v25 = vpop.f32.mrf.mxu3 }
 0x1ef   : > { %3190 = vmatmul.msk.bf16.gmra.mxu3 %vm694_vm1, %v3854_v56  ;;  %3270 = vmatmul.msk.bf16.gmra.mxu1 %vm694_vm1, %v3592_v58  ;;  %v1749_v56 = vsel %vm917_vm2, %v1744_v24, %v1748_v37  ;;  %v2398_v58 = vshrl.u32 %v3658_v10, 16  ;;  %v3608_v10 = vld [vmem:[%s4682_s3 + $0x50] sm:$0xff] }
 0x1f0   : > { %v4240_v6 = vpop.f32.mrf.mxu2  ;;  %1988 = vmatpush.bf16.msrb.mxu3 %v3608_v10  ;;  %v3659_v10 = vld [vmem:[#allocation2 + $0x10] sm:$0xf0] }
 0x1f1   : > { %v2403_v30 = vor.u32 %v2402_v53, %v2398_v58  ;;  %v817_v58 = vadd.f32 %v3969_v20, %v4175_v34  ;;  %v2648_v34 = vrot.slane %v4229_v22, 1 }
 0x1f2   : > { %v4227_v45 = vpop.f32.mrf.mxu3 }
 0x1f3   : > { %v2408_v24 = vsel %vm917_vm2, %v2403_v30, %v2407_v4 }
 0x1f5   : > { %3337 = vmatmul.msk.bf16.gmra.mxu2 %vm694_vm1, %v1749_v56  ;;  %v1752_v56 = vor.u32 %v1750_v8, %v1748_v37  ;;  %v2413_v37 = vshll.u32 %v4251_v47, 16  ;;  %v2409_v8 = vshrl.u32 %v4229_v22, 16  ;;  %v819_v22 = vadd.f32 %v3969_v20, %v4191_v29 }
 0x1f6   : > { %v2650_v29 = vrot.slane %v4251_v47, 1 }
 0x1f7   : > { %v1757_v30 = vsel %vm917_vm2, %v1752_v56, %v1756_v1  ;;  %v3660_v56 = vld [vmem:[#allocation2 + $0x10] sm:$0xe] }
 0x1f8   : > { %v4259_v18 = vpop.f32.mrf.mxu2  ;;  %v3661_v1 = vor.u32 %v3660_v56, %v3659_v10 }
 0x1fa   : > { %v4234_v32 = vpop.f32.mrf.mxu3 }
 0x1ff   : > { %3191 = vmatmul.msk.bf16.gmra.mxu3 %vm694_vm1, %v3871_v15  ;;  %3491 = vmatmul.msk.bf16.vlgmr.msra.gmra.mxu1 %vm694_vm1, %v2408_v24  ;;  %v4257_v15 = vpop.f32.mrf.mxu1  ;;  %v2415_v24 = vrot.slane %v2413_v37, 1  ;;  %v818_v37 = vadd.f32 %v3969_v20, %v4185_v3 }
 0x200   : > { %4695 = vst [vmem:[#allocation10_spill] sm:$0xff] %v4257_v15  ;;  %v4274_v59 = vpop.f32.mrf.mxu2 }
 0x202   : > { %v1115_v36 = vpop.f32.mrf.mxu3 }
 0x203   : > { %v4253_v53 = vadd.f32 %v1115_v36, %v816_v57  ;;  %v2411_v36 = vor.u32 %v2409_v8, %v2407_v4 }
 0x205   : > { %3338 = vmatmul.msk.bf16.gmra.mxu2 %vm694_vm1, %v1757_v30  ;;  %v2416_v30 = vsel %vm917_vm2, %v2411_v36, %v2415_v24 }
 0x207   : > { %v4268_v15 = vpop.f32.mrf.mxu1 }
 0x208   : > { %4696 = vst [vmem:[#allocation11_spill] sm:$0xff] %v4268_v15  ;;  %v4289_v56 = vpop.f32.mrf.mxu2 }
 0x209   : > { %4698 = vst [vmem:[#allocation13_spill] sm:$0xff] %v4289_v56 }
 0x20a   : > { %v1117_v5 = vpop.f32.mrf.mxu3 }
 0x20b   : > { %v4265_v57 = vadd.f32 %v1117_v5, %v817_v58  ;;  %v2647_v58 = vrot.slane %v3661_v1, 1  ;;  %v4278_v5 = vld [vmem:[#allocation2 + $0x28] sm:$0xff]  ;;  %v2417_v1 = vshrl.u32 %v4251_v47, 16  ;;  %v821_v47 = vadd.f32 %v3969_v20, %v4213_v25 }
 0x20c   : > { %v2652_v25 = vrot.slane %v4278_v5, 1 }
 0x20d   : > { %v2649_v10 = vsel %vm1168_vm3, %v2647_v58, %v2648_v34 }
 0x20f   : > { %3192 = vmatmul.msk.bf16.gmra.mxu3 %vm694_vm1, %v3894_v44  ;;  %3492 = vmatmul.msk.bf16.gmra.mxu1 %vm694_vm1, %v2416_v30  ;;  %v2421_v44 = vshll.u32 %v4278_v5, 16  ;;  %v4287_v36 = vpop.f32.mrf.mxu1 }
 0x210   : > { %4697 = vst [vmem:[#allocation12_spill] sm:$0xff] %v4287_v36  ;;  %v4301_v36 = vld [vmem:[#allocation2 + $0x30] sm:$0xff] }
 0x211   : > { %v2423_v30 = vrot.slane %v2421_v44, 1 }
 0x212   : > { %v1120_v4 = vpop.f32.mrf.mxu3 }
 0x213   : > { %v4280_v8 = vadd.f32 %v1120_v4, %v818_v37  ;;  %v2419_v37 = vor.u32 %v2417_v1, %v2415_v24  ;;  %v820_v4 = vadd.f32 %v3969_v20, %v4205_v48  ;;  %v2651_v24 = vsel %vm1168_vm3, %v2648_v34, %v2650_v29 }
 0x214   : > { %v2425_v48 = vshrl.u32 %v4278_v5, 16 }
 0x215   : > { %3515 = vmatmul.msk.bf16.vlgmr.msra.gmra.mxu2 %vm694_vm1, %v2649_v10  ;;  %v2424_v58 = vsel %vm917_vm2, %v2419_v37, %v2423_v30 }
 0x217   : > { %v4303_v56 = vpop.f32.mrf.mxu1 }
 0x218   : > { %4699 = vst [vmem:[#allocation14_spill] sm:$0xff] %v4303_v56 }
 0x21a   : > { %v1122_v3 = vpop.f32.mrf.mxu3 }
 0x21b   : > { %v4292_v15 = vadd.f32 %v1122_v3, %v819_v22  ;;  %v4308_v22 = vpop.f32.mrf.mxu2 }
 0x21f   : > { %3193 = vmatmul.msk.bf16.gmra.mxu3 %vm694_vm1, %v3917_v9  ;;  %3493 = vmatmul.msk.bf16.gmra.mxu1 %vm694_vm1, %v2424_v58  ;;  %v2429_v9 = vshll.u32 %v4301_v36, 16  ;;  %v2427_v58 = vor.u32 %v2425_v48, %v2423_v30  ;;  %v2653_v30 = vsel %vm1168_vm3, %v2650_v29, %v2652_v25  ;;  %v2654_v29 = vrot.slane %v4301_v36, 1 }
 0x221   : > { %v2431_v1 = vrot.slane %v2429_v9, 1 }
 0x222   : > { %v1125_v10 = vpop.f32.mrf.mxu3 }
 0x223   : > { %v4305_v44 = vadd.f32 %v1125_v10, %v820_v4  ;;  %v4317_v4 = vpop.f32.mrf.mxu1  ;;  %v4319_v10 = vpop.f32.mrf.mxu2  ;;  %v2432_v34 = vsel %vm917_vm2, %v2427_v58, %v2431_v1 }
 0x224   : > { %4700 = vst [vmem:[#allocation15_spill] sm:$0xff] %v4317_v4 }
 0x225   : > { %3516 = vmatmul.msk.bf16.gmra.mxu2 %vm694_vm1, %v2651_v24  ;;  %v822_v24 = vadd.f32 %v3969_v20, %v4227_v45 }
 0x22a   : > { %v1127_v3 = vpop.f32.mrf.mxu3 }
 0x22b   : > { %v4315_v37 = vadd.f32 %v1127_v3, %v821_v47  ;;  %v3628_v47 = vld [vmem:[#allocation2 + $0x38] sm:$0xff]  ;;  %v4332_v58 = vpop.f32.mrf.mxu1  ;;  %v4334_v4 = vpop.f32.mrf.mxu2 }
 0x22c   : > { %v2437_v48 = vshll.u32 %v3628_v47, 16  ;;  %4701 = vst [vmem:[#allocation16_spill] sm:$0xff] %v4332_v58 }
 0x22e   : > { %v2439_v45 = vrot.slane %v2437_v48, 1 }
 0x22f   : > { %3194 = vmatmul.msk.bf16.gmra.mxu3 %vm694_vm1, %v3941_v42  ;;  %3494 = vmatmul.msk.bf16.gmra.mxu1 %vm694_vm1, %v2432_v34  ;;  %v823_v42 = vadd.f32 %v3969_v20, %v4234_v32  ;;  %v2433_v34 = vshrl.u32 %v4301_v36, 16  ;;  %v3629_v32 = vld [vmem:[#allocation2 + $0x40] sm:$0xff] }
 0x232   : > { %v1130_v9 = vpop.f32.mrf.mxu3 }
 0x233   : > { %v4328_v3 = vadd.f32 %v1130_v9, %v822_v24  ;;  %v2435_v24 = vor.u32 %v2433_v34, %v2431_v1  ;;  %v4348_v58 = vpop.f32.mrf.mxu2  ;;  %v2655_v1 = vsel %vm1168_vm3, %v2652_v25, %v2654_v29  ;;  %v2441_v34 = vshrl.u32 %v3628_v47, 16 }
 0x234   : > { %v2656_v25 = vrot.slane %v3628_v47, 1 }
 0x235   : > { %3517 = vmatmul.msk.bf16.gmra.mxu2 %vm694_vm1, %v2653_v30  ;;  %v2440_v9 = vsel %vm917_vm2, %v2435_v24, %v2439_v45  ;;  %v4346_v30 = vpop.f32.mrf.mxu1 }
 0x236   : > { %4702 = vst [vmem:[#allocation17_spill] sm:$0xff] %v4346_v30 }
 0x23a   : > { %v1132_v5 = vpop.f32.mrf.mxu3 }
 0x23b   : > { %v4339_v56 = vadd.f32 %v1132_v5, %v823_v42  ;;  %v3621_v42 = vld [vmem:[#allocation2 + $0x68] sm:$0xff]  ;;  %v2445_v5 = vshll.u32 %v3629_v32, 16  ;;  %v4361_v30 = vpop.f32.mrf.mxu2 }
 0x23c   : > { %3434 = vmatmul.msk.bf16.gmra.mxu0 %vm694_vm1, %v3621_v42  ;;  %4704 = vst [vmem:[#allocation19_spill] sm:$0xff] %v4361_v30  ;;  %v4367_v42 = vld [vmem:[#allocation2 + $0x48] sm:$0xff] }
 0x23d   : > { %v2447_v36 = vrot.slane %v2445_v5, 1  ;;  %v4356_v24 = vpop.f32.mrf.mxu1 }
 0x23e   : > { %4703 = vst [vmem:[#allocation18_spill] sm:$0xff] %v4356_v24 }
 0x23f   : > { %3195 = vmatmul.msk.bf16.gmra.mxu3 %vm694_vm1, %v3964_v19  ;;  %3495 = vmatmul.msk.bf16.gmra.mxu1 %vm694_vm1, %v2440_v9 }
 0x242   : > { %v1251_v20 = vpop.f32.mrf.mxu3 }
 0x243   : > { %v4351_v48 = vadd.f32 %v1251_v20, %v3980_v43  ;;  %v2443_v43 = vor.u32 %v2441_v34, %v2439_v45  ;;  %v4376_v45 = vpop.f32.mrf.mxu2  ;;  %v2453_v34 = vshll.u32 %v4367_v42, 16 }
 0x244   : > { %4706 = vst [vmem:[#allocation21_spill] sm:$0xff] %v4376_v45  ;;  %v4390_v45 = vld [vmem:[#allocation2 + $0x50] sm:$0xff] }
 0x245   : > { %3518 = vmatmul.msk.bf16.gmra.mxu2 %vm694_vm1, %v2655_v1  ;;  %v2448_v20 = vsel %vm917_vm2, %v2443_v43, %v2447_v36  ;;  %v2449_v43 = vshrl.u32 %v3629_v32, 16 }
 0x247   : > { %v2451_v24 = vor.u32 %v2449_v43, %v2447_v36  ;;  %v2461_v36 = vshll.u32 %v4390_v45, 16 }
 0x249   : > { %v2463_v43 = vrot.slane %v2461_v36, 1 }
 0x24a   : > { %v1253_v19 = vpop.f32.mrf.mxu3 }
 0x24b   : > { %v4359_v9 = vadd.f32 %v1253_v19, %v3997_v11  ;;  %v2657_v11 = vsel %vm1168_vm3, %v2654_v29, %v2656_v25  ;;  %v4374_v19 = vpop.f32.mrf.mxu1  ;;  %v2658_v29 = vrot.slane %v3629_v32, 1  ;;  %v2457_v32 = vshrl.u32 %v4367_v42, 16 }
 0x24c   : > { %4705 = vst [vmem:[#allocation20_spill] sm:$0xff] %v4374_v19 }
 0x24f   : > { %3196 = vmatmul.msk.bf16.gmra.mxu3 %vm694_vm1, %v4000_v14  ;;  %3496 = vmatmul.msk.bf16.gmra.mxu1 %vm694_vm1, %v2448_v20  ;;  %v2455_v20 = vrot.slane %v2453_v34, 1 }
 0x252   : > { %v1256_v1 = vpop.f32.mrf.mxu3 }
 0x253   : > { %v4370_v5 = vadd.f32 %v1256_v1, %v4016_v49  ;;  %v2456_v49 = vsel %vm917_vm2, %v2451_v24, %v2455_v20  ;;  %v4383_v1 = vpop.f32.mrf.mxu1 }
 0x254   : > { %4707 = vst [vmem:[#allocation22_spill] sm:$0xff] %v4383_v1  ;;  %v2459_v1 = vor.u32 %v2457_v32, %v2455_v20 }
 0x255   : > { %3519 = vmatmul.msk.bf16.gmra.mxu2 %vm694_vm1, %v2657_v11  ;;  %v4388_v11 = vpop.f32.mrf.mxu2 }
 0x256   : > { %4708 = vst [vmem:[#allocation23_spill] sm:$0xff] %v4388_v11 }
 0x25a   : > { %v1258_v14 = vpop.f32.mrf.mxu3 }
 0x25b   : > { %v4380_v47 = vadd.f32 %v1258_v14, %v4033_v12  ;;  %v2659_v12 = vsel %vm1168_vm3, %v2656_v25, %v2658_v29  ;;  %v4398_v24 = vpop.f32.mrf.mxu1  ;;  %v2660_v25 = vrot.slane %v4367_v42, 1 }
 0x25c   : > { %4709 = vst [vmem:[#allocation24_spill] sm:$0xff] %v4398_v24 }
 0x25f   : > { %3197 = vmatmul.msk.bf16.gmra.mxu3 %vm694_vm1, %v4036_v13  ;;  %3497 = vmatmul.msk.bf16.gmra.mxu1 %vm694_vm1, %v2456_v49  ;;  %v4400_v13 = vpop.f32.mrf.mxu2 }
 0x260   : > { %4710 = vst [vmem:[#allocation25_spill] sm:$0xff] %v4400_v13 }
 0x262   : > { %v1261_v19 = vpop.f32.mrf.mxu3 }
 0x263   : > { %v4393_v34 = vadd.f32 %v1261_v19, %v4051_v50  ;;  %v2464_v50 = vsel %vm917_vm2, %v2459_v1, %v2463_v43  ;;  %v4413_v24 = vpop.f32.mrf.mxu1  ;;  %v3655_v1 = vld [vmem:[#allocation2 + $0x8] sm:$0xf0] }
 0x264   : > { %4711 = vst [vmem:[#allocation26_spill] sm:$0xff] %v4413_v24 }
 0x265   : > { %3520 = vmatmul.msk.bf16.gmra.mxu2 %vm694_vm1, %v2659_v12  ;;  %v4411_v12 = vld [vmem:[#allocation2 + $0x58] sm:$0xff] }
 0x267   : > { %v4419_v20 = vpop.f32.mrf.mxu2 }
 0x268   : > { %4712 = vst [vmem:[#allocation27_spill] sm:$0xff] %v4419_v20 }
 0x26a   : > { %v1263_v14 = vpop.f32.mrf.mxu3 }
 0x26b   : > { %v4404_v49 = vadd.f32 %v1263_v14, %v4074_v23  ;;  %v2661_v23 = vsel %vm1168_vm3, %v2658_v29, %v2660_v25  ;;  %v3656_v14 = vld [vmem:[#allocation2 + $0x8] sm:$0xe]  ;;  %v4427_v11 = vpop.f32.mrf.mxu1 }
 0x26c   : > { %v3657_v32 = vor.u32 %v3656_v14, %v3655_v1  ;;  %v2662_v1 = vrot.slane %v4390_v45, 1 }
 0x26e   : > { %v2663_v14 = vsel %vm1168_vm3, %v2660_v25, %v2662_v1  ;;  %v2664_v25 = vrot.slane %v4411_v12, 1 }
 0x26f   : > { %3198 = vmatmul.msk.bf16.gmra.mxu3 %vm694_vm1, %v4061_v2  ;;  %3498 = vmatmul.msk.bf16.gmra.mxu1 %vm694_vm1, %v2464_v50  ;;  %v2469_v2 = vshll.u32 %v4411_v12, 16  ;;  %v2465_v50 = vshrl.u32 %v4390_v45, 16  ;;  %v4429_v29 = vpop.f32.mrf.mxu2 }
 0x271   : > { %v2471_v13 = vrot.slane %v2469_v2, 1  ;;  %v3633_v2 = vld [vmem:[#allocation2 + $0x60] sm:$0xff] }
 0x272   : > { %v1266_v19 = vpop.f32.mrf.mxu3 }
 0x273   : > { %v4416_v36 = vadd.f32 %v1266_v19, %v4089_v31  ;;  %v1908_v31 = vrot.slane %v3657_v32, 1  ;;  %v2467_v19 = vor.u32 %v2465_v50, %v2463_v43  ;;  %v4443_v32 = vpop.f32.mrf.mxu1 }
 0x274   : > { %4714 = vst [vmem:[#allocation28_spill] sm:$0xff] %v4443_v32 }
 0x275   : > { %3521 = vmatmul.msk.bf16.gmra.mxu2 %vm694_vm1, %v2661_v23  ;;  %v4713_v23 = vrot.slane %v3824_v26, 1  ;;  %v2472_v30 = vsel %vm917_vm2, %v2467_v19, %v2471_v13  ;;  %v2477_v26 = vshll.u32 %v3633_v2, 16 }
 0x277   : > { %v1910_v20 = vsel %vm1168_vm3, %v1908_v31, %v4713_v23 }
 0x27a   : > { %v1268_v42 = vpop.f32.mrf.mxu3 }
 0x27b   : > { %v4425_v24 = vadd.f32 %v1268_v42, %v4107_v46  ;;  %v4445_v42 = vpop.f32.mrf.mxu2  ;;  %v4456_v19 = vpop.f32.mrf.mxu1 }
 0x27c   : > { %4715 = vst [vmem:[#allocation29_spill] sm:$0xff] %v4456_v19  ;;  %v2328_v19 = vld [vmem:[#allocation2 + $0x70] sm:$0x1] }
 0x27f   : > { %3351 = vmatmul.msk.bf16.vlgmr.msrb.gmra.mxu3 %vm694_vm1, %v1910_v20  ;;  %3499 = vmatmul.msk.bf16.gmra.mxu1 %vm694_vm1, %v2472_v30  ;;  %v2473_v20 = vshrl.u32 %v4411_v12, 16  ;;  %v2479_v30 = vrot.slane %v2477_v26, 1 }
 0x281   : > { %v2475_v31 = vor.u32 %v2473_v20, %v2471_v13  ;;  %v2481_v13 = vshrl.u32 %v3633_v2, 16 }
 0x282   : > { %v1271_v46 = vpop.f32.mrf.mxu3 }
 0x283   : > { %v4439_v43 = vadd.f32 %v1271_v46, %v4113_v54  ;;  %v2480_v54 = vsel %vm917_vm2, %v2475_v31, %v2479_v30  ;;  %v4458_v23 = vpop.f32.mrf.mxu2  ;;  %v2483_v20 = vor.u32 %v2481_v13, %v2479_v30 }
 0x285   : > { %3522 = vmatmul.msk.bf16.gmra.mxu2 %vm694_vm1, %v2663_v14  ;;  %v3634_v14 = vld [vmem:[#allocation2 + $0x68] sm:$0xff] }
 0x28a   : > { %v1273_v50 = vpop.f32.mrf.mxu3 }
 0x28b   : > { %v4449_v45 = vadd.f32 %v1273_v50, %v4123_v55  ;;  %v2665_v55 = vsel %vm1168_vm3, %v2662_v1, %v2664_v25  ;;  %v2485_v50 = vshll.u32 %v3634_v14, 16  ;;  %v4470_v32 = vpop.f32.mrf.mxu2  ;;  %v2666_v1 = vrot.slane %v3633_v2, 1 }
 0x28c   : > { %4717 = vst [vmem:[#allocation31_spill] sm:$0xff] %v4470_v32 }
 0x28d   : > { %v2487_v31 = vrot.slane %v2485_v50, 1 }
 0x28f   : > { %3352 = vmatmul.msk.bf16.gmra.mxu3 %vm694_vm1, %v3843_v39  ;;  %3500 = vmatmul.msk.bf16.gmra.mxu1 %vm694_vm1, %v2480_v54  ;;  %v4465_v54 = vpop.f32.mrf.mxu1 }
 0x290   : > { %4716 = vst [vmem:[#allocation30_spill] sm:$0xff] %v4465_v54 }
 0x292   : > { %v1276_v46 = vpop.f32.mrf.mxu3 }
 0x293   : > { %v4461_v26 = vadd.f32 %v1276_v46, %v4135_v35  ;;  %v2488_v35 = vsel %vm917_vm2, %v2483_v20, %v2487_v31  ;;  %v2383_v46 = vunpack.c.l.b16 %v2328_v19  ;;  %v2489_v19 = vshrl.u32 %v3634_v14, 16 }
 0x295   : > { %3523 = vmatmul.msk.bf16.gmra.mxu2 %vm694_vm1, %v2665_v55  ;;  %v2396_v30 = vpack.c.b16 %v2383_v46, %v2383_v46 }
 0x297   : > { %v4481_v50 = vpop.f32.mrf.mxu1  ;;  %v2493_v20 = vshll.u32 %v2396_v30, 16 }
 0x298   : > { %4718 = vst [vmem:[#allocation32_spill] sm:$0xff] %v4481_v50 }
 0x299   : > { %v2495_v32 = vrot.slane %v2493_v20, 1 }
 0x29a   : > { %v1278_v39 = vpop.f32.mrf.mxu3 }
 0x29b   : > { %v4468_v12 = vadd.f32 %v1278_v39, %v4148_v60  ;;  %v2667_v60 = vsel %vm1168_vm3, %v2664_v25, %v2666_v1  ;;  %v4483_v39 = vpop.f32.mrf.mxu2  ;;  %v2668_v25 = vrot.slane %v3634_v14, 1 }
 0x29c   : > { %4719 = vst [vmem:[#allocation33_spill] sm:$0xff] %v4483_v39 }
 0x29f   : > { %3353 = vmatmul.msk.bf16.gmra.mxu3 %vm694_vm1, %v3860_v61  ;;  %3501 = vmatmul.msk.bf16.gmra.mxu1 %vm694_vm1, %v2488_v35  ;;  %v2491_v61 = vor.u32 %v2489_v19, %v2487_v31  ;;  %v2669_v31 = vsel %vm1168_vm3, %v2666_v1, %v2668_v25 }
 0x2a1   : > { %v2496_v35 = vsel %vm917_vm2, %v2491_v61, %v2495_v32 }
 0x2a2   : > { %v1281_v55 = vpop.f32.mrf.mxu3 }
 0x2a3   : > { %v4477_v13 = vadd.f32 %v1281_v55, %v4153_v40  ;;  %v4489_v40 = vpop.f32.mrf.mxu1  ;;  %v4494_v46 = vpop.f32.mrf.mxu2 }
 0x2a4   : > { %4720 = vst [vmem:[#allocation34_spill] sm:$0xff] %v4489_v40 }
 0x2a5   : > { %3524 = vmatmul.msk.bf16.gmra.mxu2 %vm694_vm1, %v2667_v60  ;;  %4721 = vst [vmem:[#allocation35_spill] sm:$0xff] %v4494_v46  ;;  %v1542_v46 = vadd.f32 %v4187_v28, %v4359_v9  ;;  %v1543_v28 = vadd.f32 %v4197_v38, %v4370_v5 }
 0x2aa   : > { %v1283_v54 = vpop.f32.mrf.mxu3 }
 0x2ab   : > { %v4486_v2 = vadd.f32 %v1283_v54, %v4164_v27  ;;  %v4501_v27 = vpop.f32.mrf.mxu2 }
 0x2ac   : > { %4722 = vst [vmem:[#allocation36_spill] sm:$0xff] %v4501_v27  ;;  %v4729_v27 = vld [vmem:[#allocation3_spill] sm:$0xff] }
 0x2af   : > { %3354 = vmatmul.msk.bf16.gmra.mxu3 %vm694_vm1, %v3877_v21  ;;  %3502 = vmatmul.msk.bf16.gmra.mxu1 %vm694_vm1, %v2496_v35  ;;  %v2670_v21 = vrot.slane %v2396_v30, 1  ;;  %v2220_v30 = vpop.f32.mrf.mxu0 }
 0x2b2   : > { %v1286_v55 = vpop.f32.mrf.mxu3 }
 0x2b3   : > { %v4497_v60 = vadd.f32 %v1286_v55, %v4171_v17  ;;  %v2671_v17 = vsel %vm1168_vm3, %v2668_v25, %v2670_v21  ;;  %v4512_v20 = vpop.f32.mrf.mxu2 }
 0x2b4   : > { %4723 = vst [vmem:[#allocation37_spill] sm:$0xff] %v4512_v20 }
 0x2b5   : > { %3525 = vmatmul.msk.bf16.gmra.mxu2 %vm694_vm1, %v2669_v31 }
 0x2b7   : > { %v2222_v31 = vpop.f32.mrf.mxu0 }
 0x2ba   : > { %v1288_v32 = vpop.f32.mrf.mxu3 }
 0x2bb   : > { %v4504_v54 = vadd.f32 %v1288_v32, %v4183_v62  ;;  %v2729_v35 = vpop.f32.mrf.mxu2 }
 0x2bf   : > { %3355 = vmatmul.msk.bf16.gmra.mxu3 %vm694_vm1, %v3900_v51 }
 0x2c2   : > { %v1291_v14 = vpop.f32.mrf.mxu3 }
 0x2c3   : > { %v4509_v19 = vadd.f32 %v1291_v14, %v4253_v53  ;;  %v2554_v53 = vpop.f32.mrf.mxu1 }
 0x2c5   : > { %3526 = vmatmul.msk.bf16.gmra.mxu2 %vm694_vm1, %v2671_v17 }
 0x2ca   : > { %v1293_v1 = vpop.f32.mrf.mxu3 }
 0x2cb   : > { %v4516_v61 = vadd.f32 %v1293_v1, %v4265_v57  ;;  %v2556_v57 = vpop.f32.mrf.mxu1 }
 0x2cf   : > { %3356 = vmatmul.msk.bf16.gmra.mxu3 %vm694_vm1, %v3923_v16  ;;  %v2731_v16 = vpop.f32.mrf.mxu2 }
 0x2d2   : > { %v1296_v62 = vpop.f32.mrf.mxu3 }
 0x2d3   : > { %v4521_v51 = vadd.f32 %v1296_v62, %v4280_v8  ;;  %v2225_v8 = vpop.f32.mrf.mxu0  ;;  %v2559_v1 = vpop.f32.mrf.mxu1 }
 0x2d7   : > { %v2734_v62 = vpop.f32.mrf.mxu2 }
 0x2da   : > { %v1298_v55 = vpop.f32.mrf.mxu3 }
 0x2db   : > { %v4524_v25 = vadd.f32 %v1298_v55, %v4292_v15  ;;  %v2227_v55 = vpop.f32.mrf.mxu0  ;;  %v2561_v20 = vpop.f32.mrf.mxu1 }
 0x2dd   : > { %4724 = vst [vmem:[#allocation38_spill] sm:$0xff] %v4524_v25 }
 0x2df   : > { %3357 = vmatmul.msk.bf16.gmra.mxu3 %vm694_vm1, %v3948_v52 }
 0x2e2   : > { %v1301_v32 = vpop.f32.mrf.mxu3 }
 0x2e3   : > { %v4529_v21 = vadd.f32 %v1301_v32, %v4305_v44  ;;  %v2736_v44 = vpop.f32.mrf.mxu2 }
 0x2e5   : > { %4725 = vst [vmem:[#allocation39_spill] sm:$0xff] %v4529_v21 }
 0x2ea   : > { %v1303_v14 = vpop.f32.mrf.mxu3 }
 0x2eb   : > { %v4532_v17 = vadd.f32 %v1303_v14, %v4315_v37  ;;  %v1541_v37 = vadd.f32 %v4173_v41, %v4351_v48  ;;  %v2230_v14 = vpop.f32.mrf.mxu0  ;;  %v1876_v41 = vadd.f32 %v4211_v0, %v1542_v46 }
 0x2ed   : > { %4726 = vst [vmem:[#allocation40_spill] sm:$0xff] %v4532_v17  ;;  %v1875_v50 = vadd.f32 %v4199_v63, %v1541_v37 }
 0x2ef   : > { %3358 = vmatmul.msk.bf16.gmra.mxu3 %vm694_vm1, %v3975_v33  ;;  %v2564_v33 = vpop.f32.mrf.mxu1 }
 0x2f2   : > { %v1306_v15 = vpop.f32.mrf.mxu3 }
 0x2f3   : > { %v4537_v52 = vadd.f32 %v1306_v15, %v4328_v3  ;;  %v2739_v3 = vpop.f32.mrf.mxu2 }
 0x2f5   : > { %4727 = vst [vmem:[#allocation41_spill] sm:$0xff] %v4537_v52 }
 0x2f7   : > { %v2566_v48 = vpop.f32.mrf.mxu1 }
 0x2fa   : > { %v1308_v32 = vpop.f32.mrf.mxu3 }
 0x2fb   : > { %v4540_v40 = vadd.f32 %v1308_v32, %v4339_v56  ;;  %v2232_v56 = vpop.f32.mrf.mxu0  ;;  %v2741_v25 = vpop.f32.mrf.mxu2 }
 0x2fd   : > { %4728 = vst [vmem:[#allocation42_spill] sm:$0xff] %v4540_v40 }
 0x2ff   : > { %3359 = vmatmul.msk.bf16.gmra.mxu3 %vm694_vm1, %v4729_v27 }
 0x302   : > { %v1990_v15 = vpop.f32.mrf.mxu3 }
 0x303   : > { %v2050_v52 = vadd.f32 %v1990_v15, %v1875_v50  ;;  %v4730_v50 = vld [vmem:[#allocation4_spill] sm:$0xff] }
 0x305   : > { %v2280_v17 = vadd.f32 %v2220_v30, %v2050_v52  ;;  %v2235_v30 = vpop.f32.mrf.mxu0  ;;  %v4731_v52 = vld [vmem:[#allocation7_spill] sm:$0xff] }
 0x306   : > { %v1544_v38 = vadd.f32 %v4731_v52, %v4380_v47 }
 0x307   : > { %v2614_v39 = vadd.f32 %v2554_v53, %v2280_v17  ;;  %v2569_v17 = vpop.f32.mrf.mxu1 }
 0x309   : > { %v2789_v32 = vadd.f32 %v2729_v35, %v2614_v39 }
 0x30a   : > { %v1992_v40 = vpop.f32.mrf.mxu3 }
 0x30b   : > { %v2813_v21 = vmax.f32 %v2789_v32, 0.0  ;;  %v2051_v27 = vadd.f32 %v1992_v40, %v1876_v41  ;;  %v1877_v40 = vadd.f32 %v4225_v7, %v1543_v28 }
 0x30d   : > { %v2837_v63 = vpack.c.bf16 %v2813_v21, %v2813_v21  ;;  %v2281_v9 = vadd.f32 %v2222_v31, %v2051_v27  ;;  %v2744_v21 = vpop.f32.mrf.mxu2  ;;  %v2237_v41 = vpop.f32.mrf.mxu0  ;;  %v4732_v27 = vld [vmem:[#allocation8_spill] sm:$0xff] }
 0x30e   : > { %v1545_v28 = vadd.f32 %v4732_v27, %v4393_v34 }
 0x30f   : > { %2861 = vst.msk [vmem:[%s4554_s12] sm:$0xf] %vm558_vm0, %v2837_v63  ;;  %v2615_v0 = vadd.f32 %v2556_v57, %v2281_v9  ;;  %3360 = vmatmul.msk.bf16.gmra.mxu3 %vm694_vm1, %v4730_v50  ;;  %v2571_v9 = vpop.f32.mrf.mxu1 }
 0x311   : > { %v2790_v39 = vadd.f32 %v2731_v16, %v2615_v0  ;;  %v1878_v16 = vadd.f32 %v4240_v6, %v1544_v38  ;;  %v4733_v0 = vld [vmem:[#allocation5_spill] sm:$0xff]  ;;  %v1879_v6 = vadd.f32 %v4259_v18, %v1545_v28 }
 0x312   : > { %v1995_v46 = vpop.f32.mrf.mxu3 }
 0x313   : > { %v2814_v53 = vmax.f32 %v2790_v39, 0.0  ;;  %v2052_v35 = vadd.f32 %v1995_v46, %v1877_v40  ;;  %v4734_v46 = vld [vmem:[#allocation9_spill] sm:$0xff] }
 0x314   : > { %v1546_v34 = vadd.f32 %v4734_v46, %v4404_v49 }
 0x315   : > { %v2838_v5 = vpack.c.bf16 %v2814_v53, %v2814_v53  ;;  %v2282_v31 = vadd.f32 %v2225_v8, %v2052_v35  ;;  %v2240_v35 = vpop.f32.mrf.mxu0 }
 0x317   : > { %2862 = vst.msk [vmem:[%s4554_s12 + $0x4] sm:$0xf] %vm558_vm0, %v2838_v5  ;;  %v2616_v57 = vadd.f32 %v2559_v1, %v2282_v31  ;;  %v2746_v1 = vpop.f32.mrf.mxu2  ;;  %v2574_v52 = vpop.f32.mrf.mxu1  ;;  %v1880_v5 = vadd.f32 %v4274_v59, %v1546_v34 }
 0x319   : > { %v2791_v37 = vadd.f32 %v2734_v62, %v2616_v57 }
 0x31a   : > { %v1997_v15 = vpop.f32.mrf.mxu3 }
 0x31b   : > { %v2815_v7 = vmax.f32 %v2791_v37, 0.0  ;;  %v2053_v32 = vadd.f32 %v1997_v15, %v1878_v16  ;;  %v4735_v37 = vld [vmem:[#allocation10_spill] sm:$0xff] }
 0x31c   : > { %v1547_v16 = vadd.f32 %v4735_v37, %v4416_v36  ;;  %v4738_v36 = vld [vmem:[#allocation11_spill] sm:$0xff] }
 0x31d   : > { %v2839_v63 = vpack.c.bf16 %v2815_v7, %v2815_v7  ;;  %v2283_v47 = vadd.f32 %v2227_v55, %v2053_v32  ;;  %v4736_v7 = vld [vmem:[#allocation6_spill] sm:$0xff]  ;;  %v4737_v32 = vld [vmem:[#allocation13_spill] sm:$0xff] }
 0x31e   : > { %v1881_v59 = vadd.f32 %v4737_v32, %v1547_v16 }
 0x31f   : > { %2863 = vst.msk [vmem:[%s4554_s12 + $0x8] sm:$0xf] %vm558_vm0, %v2839_v63  ;;  %v2617_v8 = vadd.f32 %v2561_v20, %v2283_v47  ;;  %3361 = vmatmul.msk.bf16.gmra.mxu3 %vm694_vm1, %v4733_v0  ;;  %v2576_v27 = vpop.f32.mrf.mxu1  ;;  %v1548_v0 = vadd.f32 %v4738_v36, %v4425_v24 }
 0x321   : > { %v2792_v62 = vadd.f32 %v2736_v44, %v2617_v8  ;;  %v2749_v44 = vpop.f32.mrf.mxu2 }
 0x322   : > { %v2000_v50 = vpop.f32.mrf.mxu3 }
 0x323   : > { %v2816_v39 = vmax.f32 %v2792_v62, 0.0  ;;  %v2054_v40 = vadd.f32 %v2000_v50, %v1879_v6  ;;  %v1882_v50 = vadd.f32 %v4308_v22, %v1548_v0 }
 0x325   : > { %v2840_v53 = vpack.c.bf16 %v2816_v39, %v2816_v39  ;;  %v2284_v55 = vadd.f32 %v2230_v14, %v2054_v40 }
 0x327   : > { %2864 = vst.msk [vmem:[%s4554_s12 + $0xc] sm:$0xf] %vm558_vm0, %v2840_v53  ;;  %v2618_v20 = vadd.f32 %v2564_v33, %v2284_v55  ;;  %v2242_v33 = vpop.f32.mrf.mxu0  ;;  %v2579_v34 = vpop.f32.mrf.mxu1  ;;  %v4739_v53 = vld [vmem:[#allocation12_spill] sm:$0xff] }
 0x328   : > { %v1549_v55 = vadd.f32 %v4739_v53, %v4439_v43 }
 0x329   : > { %v2793_v38 = vadd.f32 %v2739_v3, %v2618_v20  ;;  %v2751_v8 = vpop.f32.mrf.mxu2 }
 0x32a   : > { %v2002_v31 = vpop.f32.mrf.mxu3 }
 0x32b   : > { %v2817_v18 = vmax.f32 %v2793_v38, 0.0  ;;  %v2055_v57 = vadd.f32 %v2002_v31, %v1880_v5 }
 0x32d   : > { %v2841_v15 = vpack.c.bf16 %v2817_v18, %v2817_v18  ;;  %v2285_v49 = vadd.f32 %v2232_v56, %v2055_v57  ;;  %v4740_v57 = vld [vmem:[#allocation14_spill] sm:$0xff] }
 0x32e   : > { %v1550_v37 = vadd.f32 %v4740_v57, %v4449_v45  ;;  %v4746_v57 = vld [vmem:[#allocation18_spill] sm:$0xff] }
 0x32f   : > { %2865 = vst.msk [vmem:[%s4554_s12 + $0x10] sm:$0xf] %vm558_vm0, %v2841_v15  ;;  %v2619_v14 = vadd.f32 %v2566_v48, %v2285_v49  ;;  %3362 = vmatmul.msk.bf16.gmra.mxu3 %vm694_vm1, %v4736_v7  ;;  %v2245_v39 = vpop.f32.mrf.mxu0  ;;  %v2581_v15 = vpop.f32.mrf.mxu1 }
 0x331   : > { %v2794_v3 = vadd.f32 %v2741_v25, %v2619_v14  ;;  %v2754_v38 = vpop.f32.mrf.mxu2 }
 0x332   : > { %v2005_v28 = vpop.f32.mrf.mxu3 }
 0x333   : > { %v2818_v63 = vmax.f32 %v2794_v3, 0.0  ;;  %v2056_v47 = vadd.f32 %v2005_v28, %v1881_v59  ;;  %v4741_v3 = vld [vmem:[#allocation15_spill] sm:$0xff] }
 0x334   : > { %v1551_v32 = vadd.f32 %v4741_v3, %v4461_v26 }
 0x335   : > { %v2842_v56 = vpack.c.bf16 %v2818_v63, %v2818_v63  ;;  %v2286_v62 = vadd.f32 %v2235_v30, %v2056_v47 }
 0x337   : > { %2866 = vst.msk [vmem:[%s4554_s12 + $0x14] sm:$0xf] %vm558_vm0, %v2842_v56  ;;  %v2620_v48 = vadd.f32 %v2569_v17, %v2286_v62  ;;  %v1883_v17 = vadd.f32 %v4319_v10, %v1549_v55  ;;  %v2247_v18 = vpop.f32.mrf.mxu0  ;;  %v2584_v63 = vpop.f32.mrf.mxu1  ;;  %v4742_v56 = vld [vmem:[#allocation16_spill] sm:$0xff]  ;;  %v4744_v55 = vld [vmem:[#allocation17_spill] sm:$0xff] }
 0x338   : > { %v1552_v62 = vadd.f32 %v4742_v56, %v4468_v12 }
 0x339   : > { %v2795_v6 = vadd.f32 %v2744_v21, %v2620_v48  ;;  %v2756_v49 = vpop.f32.mrf.mxu2 }
 0x33a   : > { %v2007_v25 = vpop.f32.mrf.mxu3 }
 0x33b   : > { %v2819_v40 = vmax.f32 %v2795_v6, 0.0  ;;  %v2057_v46 = vadd.f32 %v2007_v25, %v1882_v50 }
 0x33d   : > { %v2843_v20 = vpack.c.bf16 %v2819_v40, %v2819_v40  ;;  %v2287_v24 = vadd.f32 %v2237_v41, %v2057_v46 }
 0x33f   : > { %2867 = vst.msk [vmem:[%s4554_s12 + $0x18] sm:$0xf] %vm558_vm0, %v2843_v20  ;;  %v2621_v30 = vadd.f32 %v2571_v9, %v2287_v24  ;;  %v1884_v9 = vadd.f32 %v4334_v4, %v1550_v37  ;;  %v2250_v28 = vpop.f32.mrf.mxu0  ;;  %v1553_v20 = vadd.f32 %v4744_v55, %v4477_v13  ;;  %v1554_v37 = vadd.f32 %v4746_v57, %v4486_v2 }
 0x341   : > { %v2796_v5 = vadd.f32 %v2746_v1, %v2621_v30 }
 0x342   : > { %v2010_v21 = vpop.f32.mrf.mxu3 }
 0x343   : > { %v2820_v22 = vmax.f32 %v2796_v5, 0.0  ;;  %v2058_v31 = vadd.f32 %v2010_v21, %v1883_v17 }
 0x345   : > { %v2844_v16 = vpack.c.bf16 %v2820_v22, %v2820_v22  ;;  %v2288_v43 = vadd.f32 %v2240_v35, %v2058_v31 }
 0x347   : > { %2868 = vst.msk [vmem:[%s4554_s12 + $0x1c] sm:$0xf] %vm558_vm0, %v2844_v16  ;;  %v2622_v41 = vadd.f32 %v2574_v52, %v2288_v43  ;;  %v1885_v52 = vadd.f32 %v4348_v58, %v1551_v32  ;;  %v2252_v6 = vpop.f32.mrf.mxu0 }
 0x349   : > { %v2797_v14 = vadd.f32 %v2749_v44, %v2622_v41  ;;  %v2759_v44 = vpop.f32.mrf.mxu2 }
 0x34a   : > { %v2012_v1 = vpop.f32.mrf.mxu3 }
 0x34b   : > { %v2821_v10 = vmax.f32 %v2797_v14, 0.0  ;;  %v2059_v7 = vadd.f32 %v2012_v1, %v1884_v9 }
 0x34d   : > { %v2845_v59 = vpack.c.bf16 %v2821_v10, %v2821_v10  ;;  %v2289_v45 = vadd.f32 %v2242_v33, %v2059_v7  ;;  %v4748_v7 = vld [vmem:[#allocation20_spill] sm:$0xff] }
 0x34e   : > { %v1555_v3 = vadd.f32 %v4748_v7, %v4497_v60 }
 0x34f   : > { %2869 = vst.msk [vmem:[%s4554_s12 + $0x20] sm:$0xf] %vm558_vm0, %v2845_v59  ;;  %v2623_v35 = vadd.f32 %v2576_v27, %v2289_v45  ;;  %v4743_v27 = vld [vmem:[#allocation19_spill] sm:$0xff]  ;;  %v2255_v17 = vpop.f32.mrf.mxu0 }
 0x350   : > { %v1886_v25 = vadd.f32 %v4743_v27, %v1552_v62 }
 0x351   : > { %v2798_v47 = vadd.f32 %v2751_v8, %v2623_v35  ;;  %v2586_v8 = vpop.f32.mrf.mxu1  ;;  %v2761_v53 = vpop.f32.mrf.mxu2 }
 0x352   : > { %v2015_v36 = vpop.f32.mrf.mxu3 }
 0x353   : > { %v2822_v4 = vmax.f32 %v2798_v47, 0.0  ;;  %v2060_v0 = vadd.f32 %v2015_v36, %v1885_v52 }
 0x355   : > { %v2846_v26 = vpack.c.bf16 %v2822_v4, %v2822_v4  ;;  %v2290_v48 = vadd.f32 %v2245_v39, %v2060_v0  ;;  %v4750_v4 = vld [vmem:[#allocation22_spill] sm:$0xff] }
 0x356   : > { %v1556_v0 = vadd.f32 %v4750_v4, %v4504_v54  ;;  %v4757_v4 = vld [vmem:[#allocation39_spill] sm:$0xff] }
 0x357   : > { %2870 = vst.msk [vmem:[%s4554_s12 + $0x24] sm:$0xf] %vm558_vm0, %v2846_v26  ;;  %v2624_v33 = vadd.f32 %v2579_v34, %v2290_v48  ;;  %v4745_v34 = vld [vmem:[#allocation21_spill] sm:$0xff]  ;;  %v2257_v10 = vpop.f32.mrf.mxu0 }
 0x358   : > { %v1887_v5 = vadd.f32 %v4745_v34, %v1553_v20 }
 0x359   : > { %v2799_v50 = vadd.f32 %v2754_v38, %v2624_v33  ;;  %v2589_v31 = vpop.f32.mrf.mxu1  ;;  %v2764_v43 = vpop.f32.mrf.mxu2 }
 0x35a   : > { %v2017_v40 = vpop.f32.mrf.mxu3 }
 0x35b   : > { %v2823_v58 = vmax.f32 %v2799_v50, 0.0  ;;  %v2061_v46 = vadd.f32 %v2017_v40, %v1886_v25 }
 0x35d   : > { %v2847_v12 = vpack.c.bf16 %v2823_v58, %v2823_v58  ;;  %v2291_v24 = vadd.f32 %v2247_v18, %v2061_v46  ;;  %v4752_v58 = vld [vmem:[#allocation24_spill] sm:$0xff] }
 0x35e   : > { %v1557_v46 = vadd.f32 %v4752_v58, %v4509_v19 }
 0x35f   : > { %2871 = vst.msk [vmem:[%s4554_s12 + $0x28] sm:$0xf] %vm558_vm0, %v2847_v12  ;;  %v2625_v39 = vadd.f32 %v2581_v15, %v2291_v24  ;;  %v4747_v15 = vld [vmem:[#allocation23_spill] sm:$0xff]  ;;  %v2260_v62 = vpop.f32.mrf.mxu0 }
 0x360   : > { %v1891_v24 = vadd.f32 %v4429_v29, %v1557_v46  ;;  %v4760_v46 = vld [vmem:[#allocation40_spill] sm:$0xff] }
 0x361   : > { %v2800_v30 = vadd.f32 %v2756_v49, %v2625_v39  ;;  %v1888_v49 = vadd.f32 %v4747_v15, %v1554_v37  ;;  %v2591_v59 = vpop.f32.mrf.mxu1 }
 0x362   : > { %v2020_v38 = vpop.f32.mrf.mxu3 }
 0x363   : > { %v2824_v21 = vmax.f32 %v2800_v30, 0.0  ;;  %v2062_v22 = vadd.f32 %v2020_v38, %v1887_v5 }
 0x365   : > { %v2848_v16 = vpack.c.bf16 %v2824_v21, %v2824_v21  ;;  %v2292_v13 = vadd.f32 %v2250_v28, %v2062_v22  ;;  %v2766_v28 = vpop.f32.mrf.mxu2 }
 0x367   : > { %2872 = vst.msk [vmem:[%s4554_s12 + $0x2c] sm:$0xf] %vm558_vm0, %v2848_v16  ;;  %v2626_v18 = vadd.f32 %v2584_v63, %v2292_v13  ;;  %v4749_v63 = vld [vmem:[#allocation25_spill] sm:$0xff]  ;;  %v2262_v20 = vpop.f32.mrf.mxu0 }
 0x368   : > { %v1889_v47 = vadd.f32 %v4749_v63, %v1555_v3 }
 0x369   : > { %v2801_v41 = vadd.f32 %v2759_v44, %v2626_v18  ;;  %v2594_v48 = vpop.f32.mrf.mxu1 }
 0x36a   : > { %v2022_v14 = vpop.f32.mrf.mxu3 }
 0x36b   : > { %v2825_v9 = vmax.f32 %v2801_v41, 0.0  ;;  %v2063_v1 = vadd.f32 %v2022_v14, %v1888_v49  ;;  %v1559_v41 = vadd.f32 %v4427_v11, %v4521_v51 }
 0x36d   : > { %v2849_v32 = vpack.c.bf16 %v2825_v9, %v2825_v9  ;;  %v2293_v2 = vadd.f32 %v2252_v6, %v2063_v1  ;;  %v4751_v6 = vld [vmem:[#allocation27_spill] sm:$0xff]  ;;  %v2769_v27 = vpop.f32.mrf.mxu2  ;;  %v1893_v1 = vadd.f32 %v4458_v23, %v1559_v41 }
 0x36e   : > { %v1890_v50 = vadd.f32 %v4751_v6, %v1556_v0  ;;  %v4758_v0 = vld [vmem:[#allocation29_spill] sm:$0xff] }
 0x36f   : > { %2873 = vst.msk [vmem:[%s4554_s12 + $0x30] sm:$0xf] %vm558_vm0, %v2849_v32  ;;  %v2627_v45 = vadd.f32 %v2586_v8, %v2293_v2  ;;  %v2265_v13 = vpop.f32.mrf.mxu0  ;;  %v4754_v32 = vld [vmem:[#allocation38_spill] sm:$0xff]  ;;  %v4755_v2 = vld [vmem:[#allocation28_spill] sm:$0xff] }
 0x371   : > { %v2802_v35 = vadd.f32 %v2761_v53, %v2627_v45  ;;  %v2596_v39 = vpop.f32.mrf.mxu1 }
 0x372   : > { %v2025_v52 = vpop.f32.mrf.mxu3 }
 0x373   : > { %v2826_v44 = vmax.f32 %v2802_v35, 0.0  ;;  %v2064_v36 = vadd.f32 %v2025_v52, %v1889_v47  ;;  %v4756_v47 = vld [vmem:[#allocation31_spill] sm:$0xff] }
 0x375   : > { %v2850_v56 = vpack.c.bf16 %v2826_v44, %v2826_v44  ;;  %v2294_v60 = vadd.f32 %v2255_v17, %v2064_v36  ;;  %v2771_v38 = vpop.f32.mrf.mxu2  ;;  %v4753_v17 = vld [vmem:[#allocation26_spill] sm:$0xff] }
 0x376   : > { %v1558_v21 = vadd.f32 %v4753_v17, %v4516_v61 }
 0x377   : > { %2874 = vst.msk [vmem:[%s4554_s12 + $0x34] sm:$0xf] %vm558_vm0, %v2850_v56  ;;  %v2628_v26 = vadd.f32 %v2589_v31, %v2294_v60  ;;  %v2267_v3 = vpop.f32.mrf.mxu0  ;;  %v1561_v56 = vadd.f32 %v4758_v0, %v4757_v4 }
 0x378   : > { %v1892_v37 = vadd.f32 %v4445_v42, %v1558_v21 }
 0x379   : > { %v2803_v33 = vadd.f32 %v2764_v43, %v2628_v26  ;;  %v2599_v18 = vpop.f32.mrf.mxu1 }
 0x37a   : > { %v2027_v25 = vpop.f32.mrf.mxu3 }
 0x37b   : > { %v2827_v8 = vmax.f32 %v2803_v33, 0.0  ;;  %v2065_v40 = vadd.f32 %v2027_v25, %v1890_v50  ;;  %v4759_v50 = vld [vmem:[#allocation33_spill] sm:$0xff] }
 0x37d   : > { %v2851_v54 = vpack.c.bf16 %v2827_v8, %v2827_v8  ;;  %v2295_v53 = vadd.f32 %v2257_v10, %v2065_v40  ;;  %v2774_v49 = vpop.f32.mrf.mxu2 }
 0x37f   : > { %2875 = vst.msk [vmem:[%s4554_s12 + $0x38] sm:$0xf] %vm558_vm0, %v2851_v54  ;;  %v2629_v55 = vadd.f32 %v2591_v59, %v2295_v53  ;;  %v1560_v59 = vadd.f32 %v4755_v2, %v4754_v32  ;;  %v2270_v26 = vpop.f32.mrf.mxu0  ;;  %v4761_v54 = vld [vmem:[#allocation30_spill] sm:$0xff] }
 0x380   : > { %v1562_v53 = vadd.f32 %v4761_v54, %v4760_v46 }
 0x381   : > { %v2804_v12 = vadd.f32 %v2766_v28, %v2629_v55  ;;  %v2601_v51 = vpop.f32.mrf.mxu1  ;;  %v1894_v52 = vadd.f32 %v4756_v47, %v1560_v59  ;;  %v4768_v59 = vld [vmem:[#allocation37_spill] sm:$0xff] }
 0x382   : > { %v2030_v30 = vpop.f32.mrf.mxu3 }
 0x383   : > { %v2828_v34 = vmax.f32 %v2804_v12, 0.0  ;;  %v2066_v5 = vadd.f32 %v2030_v30, %v1891_v24  ;;  %v4762_v30 = vld [vmem:[#allocation35_spill] sm:$0xff] }
 0x385   : > { %v2852_v19 = vpack.c.bf16 %v2828_v34, %v2828_v34  ;;  %v2296_v22 = vadd.f32 %v2260_v62, %v2066_v5  ;;  %v2776_v35 = vpop.f32.mrf.mxu2  ;;  %v1896_v34 = vadd.f32 %v4762_v30, %v1562_v53 }
 0x387   : > { %2876 = vst.msk [vmem:[%s4554_s12 + $0x3c] sm:$0xf] %vm558_vm0, %v2852_v19  ;;  %v2630_v31 = vadd.f32 %v2594_v48, %v2296_v22  ;;  %v2272_v24 = vpop.f32.mrf.mxu0  ;;  %v4763_v22 = vld [vmem:[#allocation41_spill] sm:$0xff] }
 0x389   : > { %v2805_v57 = vadd.f32 %v2769_v27, %v2630_v31  ;;  %v2604_v33 = vpop.f32.mrf.mxu1  ;;  %v1895_v27 = vadd.f32 %v4759_v50, %v1561_v56  ;;  %v4764_v31 = vld [vmem:[#allocation32_spill] sm:$0xff] }
 0x38a   : > { %v2032_v16 = vpop.f32.mrf.mxu3 }
 0x38b   : > { %v2829_v29 = vmax.f32 %v2805_v57, 0.0  ;;  %v2067_v43 = vadd.f32 %v2032_v16, %v1892_v37  ;;  %v1563_v57 = vadd.f32 %v4764_v31, %v4763_v22 }
 0x38d   : > { %v2853_v15 = vpack.c.bf16 %v2829_v29, %v2829_v29  ;;  %v2297_v61 = vadd.f32 %v2262_v20, %v2067_v43  ;;  %v2779_v25 = vpop.f32.mrf.mxu2  ;;  %v4765_v43 = vld [vmem:[#allocation36_spill] sm:$0xff] }
 0x38f   : > { %2877 = vst.msk [vmem:[%s4554_s12 + $0x40] sm:$0xf] %vm558_vm0, %v2853_v15  ;;  %v2631_v14 = vadd.f32 %v2596_v39, %v2297_v61  ;;  %v2275_v41 = vpop.f32.mrf.mxu0 }
 0x391   : > { %v2806_v9 = vadd.f32 %v2771_v38, %v2631_v14  ;;  %v2606_v5 = vpop.f32.mrf.mxu1 }
 0x392   : > { %v2035_v10 = vpop.f32.mrf.mxu3 }
 0x393   : > { %v2830_v42 = vmax.f32 %v2806_v9, 0.0  ;;  %v2068_v7 = vadd.f32 %v2035_v10, %v1893_v1  ;;  %v4766_v9 = vld [vmem:[#allocation42_spill] sm:$0xff] }
 0x394   : > { %v4767_v1 = vld [vmem:[#allocation34_spill] sm:$0xff] }
 0x395   : > { %v2854_v45 = vpack.c.bf16 %v2830_v42, %v2830_v42  ;;  %v2298_v11 = vadd.f32 %v2265_v13, %v2068_v7  ;;  %v2781_v19 = vpop.f32.mrf.mxu2  ;;  %v1564_v10 = vadd.f32 %v4767_v1, %v4766_v9 }
 0x397   : > { %2878 = vst.msk [vmem:[%s4554_s12 + $0x44] sm:$0xf] %vm558_vm0, %v2854_v45  ;;  %v2632_v28 = vadd.f32 %v2599_v18, %v2298_v11  ;;  %v1897_v18 = vadd.f32 %v4765_v43, %v1563_v57  ;;  %v1898_v45 = vadd.f32 %v4768_v59, %v1564_v10 }
 0x399   : > { %v2807_v63 = vadd.f32 %v2774_v49, %v2632_v28  ;;  %v2609_v14 = vpop.f32.mrf.mxu1 }
 0x39a   : > { %v2037_v44 = vpop.f32.mrf.mxu3 }
 0x39b   : > { %v2831_v23 = vmax.f32 %v2807_v63, 0.0  ;;  %v2069_v36 = vadd.f32 %v2037_v44, %v1894_v52 }
 0x39d   : > { %v2855_v60 = vpack.c.bf16 %v2831_v23, %v2831_v23  ;;  %v2299_v62 = vadd.f32 %v2267_v3, %v2069_v36  ;;  %v2784_v3 = vpop.f32.mrf.mxu2 }
 0x39f   : > { %2879 = vst.msk [vmem:[%s4554_s12 + $0x48] sm:$0xf] %vm558_vm0, %v2855_v60  ;;  %v2633_v48 = vadd.f32 %v2601_v51, %v2299_v62 }
 0x3a1   : > { %v2808_v6 = vadd.f32 %v2776_v35, %v2633_v48  ;;  %v2277_v35 = vpop.f32.mrf.mxu0  ;;  %v2611_v52 = vpop.f32.mrf.mxu1 }
 0x3a2   : > { %v2040_v8 = vpop.f32.mrf.mxu3 }
 0x3a3   : > { %v2832_v40 = vmax.f32 %v2808_v6, 0.0  ;;  %v2070_v58 = vadd.f32 %v2040_v8, %v1895_v27 }
 0x3a5   : > { %v2856_v55 = vpack.c.bf16 %v2832_v40, %v2832_v40  ;;  %v2300_v20 = vadd.f32 %v2270_v26, %v2070_v58  ;;  %v2786_v23 = vpop.f32.mrf.mxu2 }
 0x3a7   : > { %2880 = vst.msk [vmem:[%s4554_s12 + $0x4c] sm:$0xf] %vm558_vm0, %v2856_v55  ;;  %v2634_v12 = vadd.f32 %v2604_v33, %v2300_v20 }
 0x3a9   : > { %v2809_v39 = vadd.f32 %v2779_v25, %v2634_v12 }
 0x3aa   : > { %v2042_v38 = vpop.f32.mrf.mxu3 }
 0x3ab   : > { %v2833_v17 = vmax.f32 %v2809_v39, 0.0  ;;  %v2071_v21 = vadd.f32 %v2042_v38, %v1896_v34 }
 0x3ad   : > { %v2857_v37 = vpack.c.bf16 %v2833_v17, %v2833_v17  ;;  %v2301_v16 = vadd.f32 %v2272_v24, %v2071_v21 }
 0x3af   : > { %2881 = vst.msk [vmem:[%s4554_s12 + $0x50] sm:$0xf] %vm558_vm0, %v2857_v37  ;;  %v2635_v13 = vadd.f32 %v2606_v5, %v2301_v16 }
 0x3b1   : > { %v2810_v29 = vadd.f32 %v2781_v19, %v2635_v13 }
 0x3b2   : > { %v2045_v15 = vpop.f32.mrf.mxu3 }
 0x3b3   : > { %v2834_v61 = vmax.f32 %v2810_v29, 0.0  ;;  %v2072_v49 = vadd.f32 %v2045_v15, %v1897_v18 }
 0x3b5   : > { %v2858_v42 = vpack.c.bf16 %v2834_v61, %v2834_v61  ;;  %v2302_v7 = vadd.f32 %v2275_v41, %v2072_v49 }
 0x3b7   : > { %2882 = vst.msk [vmem:[%s4554_s12 + $0x54] sm:$0xf] %vm558_vm0, %v2858_v42  ;;  %v2636_v32 = vadd.f32 %v2609_v14, %v2302_v7 }
 0x3b9   : > { %v2811_v2 = vadd.f32 %v2784_v3, %v2636_v32 }
 0x3ba   : > { %v2047_v11 = vpop.f32.mrf.mxu3 }
 0x3bb   : > { %v2835_v51 = vmax.f32 %v2811_v2, 0.0  ;;  %v2073_v28 = vadd.f32 %v2047_v11, %v1898_v45 }
 0x3bd   : > { %v2859_v63 = vpack.c.bf16 %v2835_v51, %v2835_v51  ;;  %v2303_v47 = vadd.f32 %v2277_v35, %v2073_v28 }
 0x3bf   : > { %2883 = vst.msk [vmem:[%s4554_s12 + $0x58] sm:$0xf] %vm558_vm0, %v2859_v63  ;;  %v2637_v44 = vadd.f32 %v2611_v52, %v2303_v47 }
 0x3c1   : > { %v2812_v36 = vadd.f32 %v2786_v23, %v2637_v44 }
 0x3c3   : > { %v2836_v4 = vmax.f32 %v2812_v36, 0.0 }
 0x3c5   : > { %v2860_v0 = vpack.c.bf16 %v2836_v4, %v2836_v4 }
 0x3c7   : > { %2884 = vst.msk [vmem:[%s4554_s12 + $0x5c] sm:$0xf] %vm558_vm0, %v2860_v0 }
 0x3c8 PF: > { %s15_s18 = sadd.s32 1, %s3684_s18  }
 0x3c9   : > { %p12_p4 = scmp.ge.s32.totalorder %s15_s18, 4  }
 0x3cb   :  { %14 = sbr.rel (!%p12_p4) target bundleno = 1 (0x1), region = 78 }

</bundles_post_ra>
